<compile_context>
chip_gen: v7x
topology: tpu7x:2x2x1
jax: 0.10.0
libtpu: 0.0.40
codegen_flags: <defaults>
</compile_context>

<pallas_src>
import functools

import jax
import jax.numpy as jnp
from jax import lax
from jax.experimental import pallas as pl
from jax.experimental.pallas import tpu as pltpu


def attention_kernel(x_full_ref, x_q_ref, wqkv_ref, wout_ref, shift_ref,
                     o_ref, *, heads, dim_head):
    """One (batch element, query tile) grid step, channels-first layout."""
    inner = heads * dim_head
    cdt = x_full_ref.dtype            # native MXU input dtype; accumulate in f32

    w_qkv = wqkv_ref[...]             # [3*inner, D]  (q rows pre-scaled by 1/sqrt(dh))
    x_full = x_full_ref[...]          # [D, P]
    x_q = x_q_ref[...]                # [D, Tq]

    # K / V projections for the whole point set; Q only for this query tile.
    # Channels-first => [out, in] @ [in, points] matmuls, points on lanes.
    kv = jnp.dot(w_qkv[inner:], x_full,
                 preferred_element_type=jnp.float32).astype(cdt)     # [2*inner, P]
    q = jnp.dot(w_qkv[:inner], x_q,
                preferred_element_type=jnp.float32).astype(cdt)      # [inner, Tq]

    # Per-head attention.  Head slices are sublane (row) slices (dim_head is a
    # multiple of 8), so no lane shuffles; the only transpose is the tiny
    # [dim_head, Tq] -> [Tq, dim_head] one on q each head.
    outs = []
    for h in range(heads):
        rows = slice(h * dim_head, (h + 1) * dim_head)
        q_h = q[rows, :]                                             # [dh, Tq]
        k_h = kv[rows, :]                                            # [dh, P]
        v_h = kv[inner + h * dim_head:inner + (h + 1) * dim_head, :]  # [dh, P]

        # scores[i, j] = sum_d q[d, i] * k[d, j]; attention scale folded in W_q.
        s = jnp.dot(q_h.T, k_h, preferred_element_type=jnp.float32)  # [Tq, P]

        # Softmax over keys (lane axis) in f32; reciprocal on the (idle) EUP.
        m = jnp.max(s, axis=-1, keepdims=True)
        p = jnp.exp(s - m)
        attn = p * pl.reciprocal(jnp.sum(p, axis=-1, keepdims=True),
                                 approx=True)                        # [Tq, P] f32

        # out[d, i] = sum_j v[d, j] * attn[i, j]  -> transposed-rhs matmul; the
        # big [Tq, P] attention matrix is never transposed/materialized twice.
        o_h = lax.dot_general(v_h, attn.astype(cdt),
                              (((1,), (1,)), ((), ())),
                              preferred_element_type=jnp.float32)    # [dh, Tq]
        outs.append(o_h.astype(cdt))

    # Head "concat" == sublane-axis stack (cheap); one full-depth (K = inner)
    # output-projection matmul beats `heads` K = dim_head matmuls on the MXU.
    out_cat = jnp.concatenate(outs, axis=0)                          # [inner, Tq]

    # to_out conv bias + eval BatchNorm already folded into wout/shift.
    y = jnp.dot(wout_ref[...], out_cat,
                preferred_element_type=jnp.float32) + shift_ref[...]  # [D, Tq]
    o_ref[...] = y.astype(o_ref.dtype)


def _choose_q_tile(n_points):
    """Largest query tile (multiple of 128) keeping a per-head f32 [Tq, P]
    score block <= ~4 MiB, so everything fits comfortably in v7x's 64 MiB VMEM."""
    budget = 4 * 1024 * 1024
    for t in (512, 256, 128):
        if n_points % t == 0 and t * n_points * 4 <= budget:
            return t
    if n_points % 128 == 0:
        return 128
    return n_points   # tiny / non-multiple-of-128 inputs: single full tile


def attention_forward(x, w_qkv, w_out, b_out, bn_gamma, bn_beta,
                      bn_mean, bn_var, *, heads=8, dim_head=32, eps=1e-5):
    """Pallas forward for Attention.  x: [B, dim, P] (NCL) -> [B, dim, P].

    Parameters use PyTorch-native layouts:
      w_qkv [3*inner, dim]  (nn.Linear(dim, 3*inner, bias=False).weight)
      w_out [dim, inner]    (nn.Conv1d(inner, dim, 1).weight.squeeze(-1))
      b_out [dim], bn_* [dim]  (BatchNorm1d, eval mode)
    """
    B, D, P = x.shape
    inner = heads * dim_head
    assert w_qkv.shape == (3 * inner, D) and w_out.shape == (D, inner)

    # Fold the 1/sqrt(dim_head) attention scale into the Q rows of w_qkv
    # (zero in-kernel cost instead of scaling the score matrix per head).
    scale = jnp.asarray(dim_head ** (-0.5), w_qkv.dtype)
    w_qkv_eff = jnp.concatenate([w_qkv[:inner] * scale, w_qkv[inner:]], axis=0)

    # Fold conv bias + eval BatchNorm into the output projection:
    #   bn_s*(W@o + b - mean) + beta  ==  (bn_s[:,None]*W) @ o + shift
    bn_s = bn_gamma / jnp.sqrt(bn_var + eps)
    w_out_eff = (w_out * bn_s[:, None]).astype(w_out.dtype)
    shift = (bn_s * (b_out - bn_mean) + bn_beta).astype(jnp.float32)[:, None]  # [D,1]

    tq = _choose_q_tile(P)
    n_qt = P // tq

    kernel = functools.partial(attention_kernel, heads=heads, dim_head=dim_head)

    return pl.pallas_call(
        kernel,
        out_shape=jax.ShapeDtypeStruct((B, D, P), x.dtype),
        grid=(B, n_qt),
        in_specs=[
            # Full [D, P] slab per batch element (for K/V); block index constant
            # across the query-tile axis so it is only fetched once per batch.
            pl.BlockSpec((None, D, P), lambda b, qt: (b, 0, 0)),
            # Query tile of the same input array.
            pl.BlockSpec((None, D, tq), lambda b, qt: (b, 0, qt)),
            pl.BlockSpec((3 * inner, D), lambda b, qt: (0, 0)),   # w_qkv (scaled q)
            pl.BlockSpec((D, inner), lambda b, qt: (0, 0)),       # w_out (BN folded)
            pl.BlockSpec((D, 1), lambda b, qt: (0, 0)),           # bias/BN shift
        ],
        out_specs=pl.BlockSpec((None, D, tq), lambda b, qt: (b, 0, qt)),
        compiler_params=pltpu.CompilerParams(
            # K/V are recomputed per query tile (~10% extra MXU work at real P),
            # so there is no cross-step state and both axes can be "parallel".
            dimension_semantics=("parallel", "parallel"),
            vmem_limit_bytes=64 * 1024 * 1024),
    )(x, x, w_qkv_eff, w_out_eff, shift)


def attention_reference(x, w_qkv, w_out, b_out, bn_gamma, bn_beta,
                        bn_mean, bn_var, *, heads=8, dim_head=32, eps=1e-5):
    """Pure-JAX mirror of the PyTorch Attention.forward (BatchNorm in eval)."""
    B, D, P = x.shape
    inner = heads * dim_head
    scale = dim_head ** (-0.5)
    xt = jnp.transpose(x, (0, 2, 1))                           # [B, P, D]
    qkv = jnp.einsum('bpd,fd->bpf', xt, w_qkv)                 # [B, P, 3*inner]
    q, k, v = jnp.split(qkv, 3, axis=-1)
    split = lambda t: t.reshape(B, P, heads, dim_head).transpose(0, 2, 1, 3)
    q, k, v = split(q), split(k), split(v)                     # [B, H, P, dh]
    dots = jnp.einsum('bhid,bhjd->bhij', q, k) * scale
    attn = jax.nn.softmax(dots, axis=-1)
    out = jnp.einsum('bhij,bhjd->bhid', attn, v)               # [B, H, P, dh]
    out = out.transpose(0, 2, 1, 3).reshape(B, P, inner)       # b n (h d)
    out = jnp.transpose(out, (0, 2, 1))                        # [B, inner, P]
    y = jnp.einsum('oc,bcp->bop', w_out, out) + b_out[None, :, None]
    bn_s = bn_gamma / jnp.sqrt(bn_var + eps)
    return bn_s[None, :, None] * (y - bn_mean[None, :, None]) + bn_beta[None, :, None]


if __name__ == "__main__":
    # Small shapes consistent with the module: dim=32 channels, 16 points, batch 2.
    B, D, P = 2, 32, 16
    heads, dim_head = 8, 32          # module defaults -> inner = 256
    inner = heads * dim_head

    key = jax.random.PRNGKey(0)
    ks = jax.random.split(key, 8)

    x = jax.random.normal(ks[0], (B, D, P), jnp.float32)
    w_qkv = 0.05 * jax.random.normal(ks[1], (3 * inner, D), jnp.float32)
    w_out = 0.05 * jax.random.normal(ks[2], (D, inner), jnp.float32)
    b_out = 0.05 * jax.random.normal(ks[3], (D,), jnp.float32)
    bn_gamma = 1.0 + 0.1 * jax.random.normal(ks[4], (D,), jnp.float32)
    bn_beta = 0.1 * jax.random.normal(ks[5], (D,), jnp.float32)
    bn_mean = 0.1 * jax.random.normal(ks[6], (D,), jnp.float32)
    bn_var = 1.0 + 0.1 * jnp.abs(jax.random.normal(ks[7], (D,), jnp.float32))

    out = attention_forward(x, w_qkv, w_out, b_out, bn_gamma, bn_beta,
                            bn_mean, bn_var, heads=heads, dim_head=dim_head)
    jax.block_until_ready(out)
    assert out.shape == (B, D, P) and out.dtype == jnp.float32

    ref = attention_reference(x, w_qkv, w_out, b_out, bn_gamma, bn_beta,
                              bn_mean, bn_var, heads=heads, dim_head=dim_head)
    # Loose tolerance: approx EUP reciprocal in the softmax + folded scale/BN.
    assert jnp.allclose(out, ref, rtol=1e-2, atol=1e-2), \
        float(jnp.max(jnp.abs(out - ref)))
    print("KERNEL_OK")
</pallas_src>

<mosaic_0001>
module attributes {stable_mosaic.version = 11 : i64} {
  func.func @attention_kernel(%arg0: i32, %arg1: i32, %arg2: memref<1x32x16xf32, #tpu.memory_space<vmem>>, %arg3: memref<1x32x16xf32, #tpu.memory_space<vmem>>, %arg4: memref<768x32xf32, #tpu.memory_space<vmem>>, %arg5: memref<32x256xf32, #tpu.memory_space<vmem>>, %arg6: memref<32x1xf32, #tpu.memory_space<vmem>>, %arg7: memref<1x32x16xf32, #tpu.memory_space<vmem>>) attributes {dimension_semantics = [#tpu.dimension_semantics<parallel>, #tpu.dimension_semantics<parallel>], iteration_bounds = array<i64: 2, 1>, scalar_prefetch = 0 : i64, scratch_operands = 0 : i64, tpu.core_type = #tpu.core_type<tc>, window_params = [{transform_indices = @transform_0, window_bounds = array<i64: 1, 32, 16>}, {transform_indices = @transform_1, window_bounds = array<i64: 1, 32, 16>}, {pipeline_mode = #tpu.pipeline_mode<synchronous>, transform_indices = @transform_2, window_bounds = array<i64: 768, 32>}, {pipeline_mode = #tpu.pipeline_mode<synchronous>, transform_indices = @transform_3, window_bounds = array<i64: 32, 256>}, {pipeline_mode = #tpu.pipeline_mode<synchronous>, transform_indices = @transform_4, window_bounds = array<i64: 32, 1>}, {transform_indices = @transform_5, window_bounds = array<i64: 1, 32, 16>}]} {
    %c0 = arith.constant 0 : index
    %c0_0 = arith.constant 0 : index
    %0 = vector.load %arg4[%c0, %c0_0] : memref<768x32xf32, #tpu.memory_space<vmem>>, vector<768x32xf32>
    %c0_1 = arith.constant 0 : index
    %c0_2 = arith.constant 0 : index
    %c0_3 = arith.constant 0 : index
    %1 = vector.load %arg2[%c0_1, %c0_2, %c0_3] : memref<1x32x16xf32, #tpu.memory_space<vmem>>, vector<1x32x16xf32>
    %2 = vector.shape_cast %1 : vector<1x32x16xf32> to vector<32x16xf32>
    %c0_4 = arith.constant 0 : index
    %c0_5 = arith.constant 0 : index
    %c0_6 = arith.constant 0 : index
    %3 = vector.load %arg3[%c0_4, %c0_5, %c0_6] : memref<1x32x16xf32, #tpu.memory_space<vmem>>, vector<1x32x16xf32>
    %4 = vector.shape_cast %3 : vector<1x32x16xf32> to vector<32x16xf32>
    %5 = vector.extract_strided_slice %0 {offsets = [256, 0], sizes = [512, 32], strides = [1, 1]} : vector<768x32xf32> to vector<512x32xf32>
    %cst = arith.constant dense<0.000000e+00> : vector<512x16xf32>
    %6 = tpu.matmul %5, %2, %cst {dimension_numbers = #tpu.dot_dimension_numbers<[1], [0], [0], [1], [0, 0, 1, 1], [], []>} : vector<512x32xf32>, vector<32x16xf32>, vector<512x16xf32> -> vector<512x16xf32>
    %7 = vector.extract_strided_slice %0 {offsets = [0, 0], sizes = [256, 32], strides = [1, 1]} : vector<768x32xf32> to vector<256x32xf32>
    %cst_7 = arith.constant dense<0.000000e+00> : vector<256x16xf32>
    %8 = tpu.matmul %7, %4, %cst_7 {dimension_numbers = #tpu.dot_dimension_numbers<[1], [0], [0], [1], [0, 0, 1, 1], [], []>} : vector<256x32xf32>, vector<32x16xf32>, vector<256x16xf32> -> vector<256x16xf32>
    %9 = vector.extract_strided_slice %8 {offsets = [0, 0], sizes = [32, 16], strides = [1, 1]} : vector<256x16xf32> to vector<32x16xf32>
    %10 = vector.extract_strided_slice %6 {offsets = [0, 0], sizes = [32, 16], strides = [1, 1]} : vector<512x16xf32> to vector<32x16xf32>
    %11 = vector.extract_strided_slice %6 {offsets = [256, 0], sizes = [32, 16], strides = [1, 1]} : vector<512x16xf32> to vector<32x16xf32>
    %12 = tpu.transpose %9, [1, 0] : vector<32x16xf32> -> vector<16x32xf32>
    %cst_8 = arith.constant dense<0.000000e+00> : vector<16x16xf32>
    %13 = tpu.matmul %12, %10, %cst_8 {dimension_numbers = #tpu.dot_dimension_numbers<[1], [0], [0], [1], [0, 0, 1, 1], [], []>} : vector<16x32xf32>, vector<32x16xf32>, vector<16x16xf32> -> vector<16x16xf32>
    %cst_9 = arith.constant dense<0xFF800000> : vector<16xf32>
    %14 = vector.multi_reduction <maximumf>, %13, %cst_9 [1] : vector<16x16xf32> to vector<16xf32>
    %15 = vector.shape_cast %14 : vector<16xf32> to vector<16x1xf32>
    %16 = vector.broadcast %15 : vector<16x1xf32> to vector<16x16xf32>
    %17 = arith.subf %13, %16 : vector<16x16xf32>
    %18 = math.exp %17 : vector<16x16xf32>
    %cst_10 = arith.constant dense<0.000000e+00> : vector<16xf32>
    %19 = vector.multi_reduction <add>, %18, %cst_10 [1] : vector<16x16xf32> to vector<16xf32>
    %20 = vector.shape_cast %19 : vector<16xf32> to vector<16x1xf32>
    %21 = tpu.reciprocal %20 {approx = true} : vector<16x1xf32> -> vector<16x1xf32>
    %22 = vector.broadcast %21 : vector<16x1xf32> to vector<16x16xf32>
    %23 = arith.mulf %18, %22 : vector<16x16xf32>
    %cst_11 = arith.constant dense<0.000000e+00> : vector<32x16xf32>
    %24 = tpu.matmul %11, %23, %cst_11 {dimension_numbers = #tpu.dot_dimension_numbers<[1], [1], [0], [0], [0, 0, 1, 0], [], []>} : vector<32x16xf32>, vector<16x16xf32>, vector<32x16xf32> -> vector<32x16xf32>
    %25 = vector.extract_strided_slice %8 {offsets = [32, 0], sizes = [32, 16], strides = [1, 1]} : vector<256x16xf32> to vector<32x16xf32>
    %26 = vector.extract_strided_slice %6 {offsets = [32, 0], sizes = [32, 16], strides = [1, 1]} : vector<512x16xf32> to vector<32x16xf32>
    %27 = vector.extract_strided_slice %6 {offsets = [288, 0], sizes = [32, 16], strides = [1, 1]} : vector<512x16xf32> to vector<32x16xf32>
    %28 = tpu.transpose %25, [1, 0] : vector<32x16xf32> -> vector<16x32xf32>
    %cst_12 = arith.constant dense<0.000000e+00> : vector<16x16xf32>
    %29 = tpu.matmul %28, %26, %cst_12 {dimension_numbers = #tpu.dot_dimension_numbers<[1], [0], [0], [1], [0, 0, 1, 1], [], []>} : vector<16x32xf32>, vector<32x16xf32>, vector<16x16xf32> -> vector<16x16xf32>
    %cst_13 = arith.constant dense<0xFF800000> : vector<16xf32>
    %30 = vector.multi_reduction <maximumf>, %29, %cst_13 [1] : vector<16x16xf32> to vector<16xf32>
    %31 = vector.shape_cast %30 : vector<16xf32> to vector<16x1xf32>
    %32 = vector.broadcast %31 : vector<16x1xf32> to vector<16x16xf32>
    %33 = arith.subf %29, %32 : vector<16x16xf32>
    %34 = math.exp %33 : vector<16x16xf32>
    %cst_14 = arith.constant dense<0.000000e+00> : vector<16xf32>
    %35 = vector.multi_reduction <add>, %34, %cst_14 [1] : vector<16x16xf32> to vector<16xf32>
    %36 = vector.shape_cast %35 : vector<16xf32> to vector<16x1xf32>
    %37 = tpu.reciprocal %36 {approx = true} : vector<16x1xf32> -> vector<16x1xf32>
    %38 = vector.broadcast %37 : vector<16x1xf32> to vector<16x16xf32>
    %39 = arith.mulf %34, %38 : vector<16x16xf32>
    %cst_15 = arith.constant dense<0.000000e+00> : vector<32x16xf32>
    %40 = tpu.matmul %27, %39, %cst_15 {dimension_numbers = #tpu.dot_dimension_numbers<[1], [1], [0], [0], [0, 0, 1, 0], [], []>} : vector<32x16xf32>, vector<16x16xf32>, vector<32x16xf32> -> vector<32x16xf32>
    %41 = vector.extract_strided_slice %8 {offsets = [64, 0], sizes = [32, 16], strides = [1, 1]} : vector<256x16xf32> to vector<32x16xf32>
    %42 = vector.extract_strided_slice %6 {offsets = [64, 0], sizes = [32, 16], strides = [1, 1]} : vector<512x16xf32> to vector<32x16xf32>
    %43 = vector.extract_strided_slice %6 {offsets = [320, 0], sizes = [32, 16], strides = [1, 1]} : vector<512x16xf32> to vector<32x16xf32>
    %44 = tpu.transpose %41, [1, 0] : vector<32x16xf32> -> vector<16x32xf32>
    %cst_16 = arith.constant dense<0.000000e+00> : vector<16x16xf32>
    %45 = tpu.matmul %44, %42, %cst_16 {dimension_numbers = #tpu.dot_dimension_numbers<[1], [0], [0], [1], [0, 0, 1, 1], [], []>} : vector<16x32xf32>, vector<32x16xf32>, vector<16x16xf32> -> vector<16x16xf32>
    %cst_17 = arith.constant dense<0xFF800000> : vector<16xf32>
    %46 = vector.multi_reduction <maximumf>, %45, %cst_17 [1] : vector<16x16xf32> to vector<16xf32>
    %47 = vector.shape_cast %46 : vector<16xf32> to vector<16x1xf32>
    %48 = vector.broadcast %47 : vector<16x1xf32> to vector<16x16xf32>
    %49 = arith.subf %45, %48 : vector<16x16xf32>
    %50 = math.exp %49 : vector<16x16xf32>
    %cst_18 = arith.constant dense<0.000000e+00> : vector<16xf32>
    %51 = vector.multi_reduction <add>, %50, %cst_18 [1] : vector<16x16xf32> to vector<16xf32>
    %52 = vector.shape_cast %51 : vector<16xf32> to vector<16x1xf32>
    %53 = tpu.reciprocal %52 {approx = true} : vector<16x1xf32> -> vector<16x1xf32>
    %54 = vector.broadcast %53 : vector<16x1xf32> to vector<16x16xf32>
    %55 = arith.mulf %50, %54 : vector<16x16xf32>
    %cst_19 = arith.constant dense<0.000000e+00> : vector<32x16xf32>
    %56 = tpu.matmul %43, %55, %cst_19 {dimension_numbers = #tpu.dot_dimension_numbers<[1], [1], [0], [0], [0, 0, 1, 0], [], []>} : vector<32x16xf32>, vector<16x16xf32>, vector<32x16xf32> -> vector<32x16xf32>
    %57 = vector.extract_strided_slice %8 {offsets = [96, 0], sizes = [32, 16], strides = [1, 1]} : vector<256x16xf32> to vector<32x16xf32>
    %58 = vector.extract_strided_slice %6 {offsets = [96, 0], sizes = [32, 16], strides = [1, 1]} : vector<512x16xf32> to vector<32x16xf32>
    %59 = vector.extract_strided_slice %6 {offsets = [352, 0], sizes = [32, 16], strides = [1, 1]} : vector<512x16xf32> to vector<32x16xf32>
    %60 = tpu.transpose %57, [1, 0] : vector<32x16xf32> -> vector<16x32xf32>
    %cst_20 = arith.constant dense<0.000000e+00> : vector<16x16xf32>
    %61 = tpu.matmul %60, %58, %cst_20 {dimension_numbers = #tpu.dot_dimension_numbers<[1], [0], [0], [1], [0, 0, 1, 1], [], []>} : vector<16x32xf32>, vector<32x16xf32>, vector<16x16xf32> -> vector<16x16xf32>
    %cst_21 = arith.constant dense<0xFF800000> : vector<16xf32>
    %62 = vector.multi_reduction <maximumf>, %61, %cst_21 [1] : vector<16x16xf32> to vector<16xf32>
    %63 = vector.shape_cast %62 : vector<16xf32> to vector<16x1xf32>
    %64 = vector.broadcast %63 : vector<16x1xf32> to vector<16x16xf32>
    %65 = arith.subf %61, %64 : vector<16x16xf32>
    %66 = math.exp %65 : vector<16x16xf32>
    %cst_22 = arith.constant dense<0.000000e+00> : vector<16xf32>
    %67 = vector.multi_reduction <add>, %66, %cst_22 [1] : vector<16x16xf32> to vector<16xf32>
    %68 = vector.shape_cast %67 : vector<16xf32> to vector<16x1xf32>
    %69 = tpu.reciprocal %68 {approx = true} : vector<16x1xf32> -> vector<16x1xf32>
    %70 = vector.broadcast %69 : vector<16x1xf32> to vector<16x16xf32>
    %71 = arith.mulf %66, %70 : vector<16x16xf32>
    %cst_23 = arith.constant dense<0.000000e+00> : vector<32x16xf32>
    %72 = tpu.matmul %59, %71, %cst_23 {dimension_numbers = #tpu.dot_dimension_numbers<[1], [1], [0], [0], [0, 0, 1, 0], [], []>} : vector<32x16xf32>, vector<16x16xf32>, vector<32x16xf32> -> vector<32x16xf32>
    %73 = vector.extract_strided_slice %8 {offsets = [128, 0], sizes = [32, 16], strides = [1, 1]} : vector<256x16xf32> to vector<32x16xf32>
    %74 = vector.extract_strided_slice %6 {offsets = [128, 0], sizes = [32, 16], strides = [1, 1]} : vector<512x16xf32> to vector<32x16xf32>
    %75 = vector.extract_strided_slice %6 {offsets = [384, 0], sizes = [32, 16], strides = [1, 1]} : vector<512x16xf32> to vector<32x16xf32>
    %76 = tpu.transpose %73, [1, 0] : vector<32x16xf32> -> vector<16x32xf32>
    %cst_24 = arith.constant dense<0.000000e+00> : vector<16x16xf32>
    %77 = tpu.matmul %76, %74, %cst_24 {dimension_numbers = #tpu.dot_dimension_numbers<[1], [0], [0], [1], [0, 0, 1, 1], [], []>} : vector<16x32xf32>, vector<32x16xf32>, vector<16x16xf32> -> vector<16x16xf32>
    %cst_25 = arith.constant dense<0xFF800000> : vector<16xf32>
    %78 = vector.multi_reduction <maximumf>, %77, %cst_25 [1] : vector<16x16xf32> to vector<16xf32>
    %79 = vector.shape_cast %78 : vector<16xf32> to vector<16x1xf32>
    %80 = vector.broadcast %79 : vector<16x1xf32> to vector<16x16xf32>
    %81 = arith.subf %77, %80 : vector<16x16xf32>
    %82 = math.exp %81 : vector<16x16xf32>
    %cst_26 = arith.constant dense<0.000000e+00> : vector<16xf32>
    %83 = vector.multi_reduction <add>, %82, %cst_26 [1] : vector<16x16xf32> to vector<16xf32>
    %84 = vector.shape_cast %83 : vector<16xf32> to vector<16x1xf32>
    %85 = tpu.reciprocal %84 {approx = true} : vector<16x1xf32> -> vector<16x1xf32>
    %86 = vector.broadcast %85 : vector<16x1xf32> to vector<16x16xf32>
    %87 = arith.mulf %82, %86 : vector<16x16xf32>
    %cst_27 = arith.constant dense<0.000000e+00> : vector<32x16xf32>
    %88 = tpu.matmul %75, %87, %cst_27 {dimension_numbers = #tpu.dot_dimension_numbers<[1], [1], [0], [0], [0, 0, 1, 0], [], []>} : vector<32x16xf32>, vector<16x16xf32>, vector<32x16xf32> -> vector<32x16xf32>
    %89 = vector.extract_strided_slice %8 {offsets = [160, 0], sizes = [32, 16], strides = [1, 1]} : vector<256x16xf32> to vector<32x16xf32>
    %90 = vector.extract_strided_slice %6 {offsets = [160, 0], sizes = [32, 16], strides = [1, 1]} : vector<512x16xf32> to vector<32x16xf32>
    %91 = vector.extract_strided_slice %6 {offsets = [416, 0], sizes = [32, 16], strides = [1, 1]} : vector<512x16xf32> to vector<32x16xf32>
    %92 = tpu.transpose %89, [1, 0] : vector<32x16xf32> -> vector<16x32xf32>
    %cst_28 = arith.constant dense<0.000000e+00> : vector<16x16xf32>
    %93 = tpu.matmul %92, %90, %cst_28 {dimension_numbers = #tpu.dot_dimension_numbers<[1], [0], [0], [1], [0, 0, 1, 1], [], []>} : vector<16x32xf32>, vector<32x16xf32>, vector<16x16xf32> -> vector<16x16xf32>
    %cst_29 = arith.constant dense<0xFF800000> : vector<16xf32>
    %94 = vector.multi_reduction <maximumf>, %93, %cst_29 [1] : vector<16x16xf32> to vector<16xf32>
    %95 = vector.shape_cast %94 : vector<16xf32> to vector<16x1xf32>
    %96 = vector.broadcast %95 : vector<16x1xf32> to vector<16x16xf32>
    %97 = arith.subf %93, %96 : vector<16x16xf32>
    %98 = math.exp %97 : vector<16x16xf32>
    %cst_30 = arith.constant dense<0.000000e+00> : vector<16xf32>
    %99 = vector.multi_reduction <add>, %98, %cst_30 [1] : vector<16x16xf32> to vector<16xf32>
    %100 = vector.shape_cast %99 : vector<16xf32> to vector<16x1xf32>
    %101 = tpu.reciprocal %100 {approx = true} : vector<16x1xf32> -> vector<16x1xf32>
    %102 = vector.broadcast %101 : vector<16x1xf32> to vector<16x16xf32>
    %103 = arith.mulf %98, %102 : vector<16x16xf32>
    %cst_31 = arith.constant dense<0.000000e+00> : vector<32x16xf32>
    %104 = tpu.matmul %91, %103, %cst_31 {dimension_numbers = #tpu.dot_dimension_numbers<[1], [1], [0], [0], [0, 0, 1, 0], [], []>} : vector<32x16xf32>, vector<16x16xf32>, vector<32x16xf32> -> vector<32x16xf32>
    %105 = vector.extract_strided_slice %8 {offsets = [192, 0], sizes = [32, 16], strides = [1, 1]} : vector<256x16xf32> to vector<32x16xf32>
    %106 = vector.extract_strided_slice %6 {offsets = [192, 0], sizes = [32, 16], strides = [1, 1]} : vector<512x16xf32> to vector<32x16xf32>
    %107 = vector.extract_strided_slice %6 {offsets = [448, 0], sizes = [32, 16], strides = [1, 1]} : vector<512x16xf32> to vector<32x16xf32>
    %108 = tpu.transpose %105, [1, 0] : vector<32x16xf32> -> vector<16x32xf32>
    %cst_32 = arith.constant dense<0.000000e+00> : vector<16x16xf32>
    %109 = tpu.matmul %108, %106, %cst_32 {dimension_numbers = #tpu.dot_dimension_numbers<[1], [0], [0], [1], [0, 0, 1, 1], [], []>} : vector<16x32xf32>, vector<32x16xf32>, vector<16x16xf32> -> vector<16x16xf32>
    %cst_33 = arith.constant dense<0xFF800000> : vector<16xf32>
    %110 = vector.multi_reduction <maximumf>, %109, %cst_33 [1] : vector<16x16xf32> to vector<16xf32>
    %111 = vector.shape_cast %110 : vector<16xf32> to vector<16x1xf32>
    %112 = vector.broadcast %111 : vector<16x1xf32> to vector<16x16xf32>
    %113 = arith.subf %109, %112 : vector<16x16xf32>
    %114 = math.exp %113 : vector<16x16xf32>
    %cst_34 = arith.constant dense<0.000000e+00> : vector<16xf32>
    %115 = vector.multi_reduction <add>, %114, %cst_34 [1] : vector<16x16xf32> to vector<16xf32>
    %116 = vector.shape_cast %115 : vector<16xf32> to vector<16x1xf32>
    %117 = tpu.reciprocal %116 {approx = true} : vector<16x1xf32> -> vector<16x1xf32>
    %118 = vector.broadcast %117 : vector<16x1xf32> to vector<16x16xf32>
    %119 = arith.mulf %114, %118 : vector<16x16xf32>
    %cst_35 = arith.constant dense<0.000000e+00> : vector<32x16xf32>
    %120 = tpu.matmul %107, %119, %cst_35 {dimension_numbers = #tpu.dot_dimension_numbers<[1], [1], [0], [0], [0, 0, 1, 0], [], []>} : vector<32x16xf32>, vector<16x16xf32>, vector<32x16xf32> -> vector<32x16xf32>
    %121 = vector.extract_strided_slice %8 {offsets = [224, 0], sizes = [32, 16], strides = [1, 1]} : vector<256x16xf32> to vector<32x16xf32>
    %122 = vector.extract_strided_slice %6 {offsets = [224, 0], sizes = [32, 16], strides = [1, 1]} : vector<512x16xf32> to vector<32x16xf32>
    %123 = vector.extract_strided_slice %6 {offsets = [480, 0], sizes = [32, 16], strides = [1, 1]} : vector<512x16xf32> to vector<32x16xf32>
    %124 = tpu.transpose %121, [1, 0] : vector<32x16xf32> -> vector<16x32xf32>
    %cst_36 = arith.constant dense<0.000000e+00> : vector<16x16xf32>
    %125 = tpu.matmul %124, %122, %cst_36 {dimension_numbers = #tpu.dot_dimension_numbers<[1], [0], [0], [1], [0, 0, 1, 1], [], []>} : vector<16x32xf32>, vector<32x16xf32>, vector<16x16xf32> -> vector<16x16xf32>
    %cst_37 = arith.constant dense<0xFF800000> : vector<16xf32>
    %126 = vector.multi_reduction <maximumf>, %125, %cst_37 [1] : vector<16x16xf32> to vector<16xf32>
    %127 = vector.shape_cast %126 : vector<16xf32> to vector<16x1xf32>
    %128 = vector.broadcast %127 : vector<16x1xf32> to vector<16x16xf32>
    %129 = arith.subf %125, %128 : vector<16x16xf32>
    %130 = math.exp %129 : vector<16x16xf32>
    %cst_38 = arith.constant dense<0.000000e+00> : vector<16xf32>
    %131 = vector.multi_reduction <add>, %130, %cst_38 [1] : vector<16x16xf32> to vector<16xf32>
    %132 = vector.shape_cast %131 : vector<16xf32> to vector<16x1xf32>
    %133 = tpu.reciprocal %132 {approx = true} : vector<16x1xf32> -> vector<16x1xf32>
    %134 = vector.broadcast %133 : vector<16x1xf32> to vector<16x16xf32>
    %135 = arith.mulf %130, %134 : vector<16x16xf32>
    %cst_39 = arith.constant dense<0.000000e+00> : vector<32x16xf32>
    %136 = tpu.matmul %123, %135, %cst_39 {dimension_numbers = #tpu.dot_dimension_numbers<[1], [1], [0], [0], [0, 0, 1, 0], [], []>} : vector<32x16xf32>, vector<16x16xf32>, vector<32x16xf32> -> vector<32x16xf32>
    %137 = tpu.concatenate %24, %40, %56, %72, %88, %104, %120, %136 in 0 : vector<32x16xf32>, vector<32x16xf32>, vector<32x16xf32>, vector<32x16xf32>, vector<32x16xf32>, vector<32x16xf32>, vector<32x16xf32>, vector<32x16xf32> -> vector<256x16xf32>
    %c0_40 = arith.constant 0 : index
    %c0_41 = arith.constant 0 : index
    %138 = vector.load %arg5[%c0_40, %c0_41] : memref<32x256xf32, #tpu.memory_space<vmem>>, vector<32x256xf32>
    %cst_42 = arith.constant dense<0.000000e+00> : vector<32x16xf32>
    %139 = tpu.matmul %138, %137, %cst_42 {dimension_numbers = #tpu.dot_dimension_numbers<[1], [0], [0], [1], [0, 0, 1, 1], [], []>} : vector<32x256xf32>, vector<256x16xf32>, vector<32x16xf32> -> vector<32x16xf32>
    %c0_43 = arith.constant 0 : index
    %c0_44 = arith.constant 0 : index
    %140 = vector.load %arg6[%c0_43, %c0_44] : memref<32x1xf32, #tpu.memory_space<vmem>>, vector<32x1xf32>
    %141 = vector.broadcast %140 : vector<32x1xf32> to vector<32x16xf32>
    %142 = arith.addf %139, %141 : vector<32x16xf32>
    %c0_45 = arith.constant 0 : index
    %c0_46 = arith.constant 0 : index
    %c0_47 = arith.constant 0 : index
    %143 = vector.load %arg7[%c0_45, %c0_46, %c0_47] : memref<1x32x16xf32, #tpu.memory_space<vmem>>, vector<1x32x16xf32>
    %144 = vector.shape_cast %143 : vector<1x32x16xf32> to vector<32x16xf32>
    %145 = vector.shape_cast %142 : vector<32x16xf32> to vector<1x32x16xf32>
    tpu.vector_store %arg7[%c0_45, %c0_46, %c0_47], %145 {strides = array<i32>} : memref<1x32x16xf32, #tpu.memory_space<vmem>>, vector<1x32x16xf32>,
    return
  }
  func.func @transform_0(%arg0: i32, %arg1: i32) -> (i32, i32, i32) {
    %c0_i32 = arith.constant 0 : i32
    %c0_i32_0 = arith.constant 0 : i32
    %c0_i32_1 = arith.constant 0 : i32
    return %arg0, %c0_i32, %c0_i32_0 : i32, i32, i32
  }
  func.func @transform_1(%arg0: i32, %arg1: i32) -> (i32, i32, i32) {
    %c0_i32 = arith.constant 0 : i32
    %c0_i32_0 = arith.constant 0 : i32
    return %arg0, %c0_i32, %arg1 : i32, i32, i32
  }
  func.func @transform_2(%arg0: i32, %arg1: i32) -> (i32, i32) {
    %c0_i32 = arith.constant 0 : i32
    %c0_i32_0 = arith.constant 0 : i32
    %c0_i32_1 = arith.constant 0 : i32
    return %c0_i32, %c0_i32_0 : i32, i32
  }
  func.func @transform_3(%arg0: i32, %arg1: i32) -> (i32, i32) {
    %c0_i32 = arith.constant 0 : i32
    %c0_i32_0 = arith.constant 0 : i32
    %c0_i32_1 = arith.constant 0 : i32
    return %c0_i32, %c0_i32_0 : i32, i32
  }
  func.func @transform_4(%arg0: i32, %arg1: i32) -> (i32, i32) {
    %c0_i32 = arith.constant 0 : i32
    %c0_i32_0 = arith.constant 0 : i32
    %c0_i32_1 = arith.constant 0 : i32
    return %c0_i32, %c0_i32_0 : i32, i32
  }
  func.func @transform_5(%arg0: i32, %arg1: i32) -> (i32, i32, i32) {
    %c0_i32 = arith.constant 0 : i32
    %c0_i32_0 = arith.constant 0 : i32
    return %arg0, %c0_i32, %arg1 : i32, i32, i32
  }
}

</mosaic_0001>

<bundles_post_ra>
// kernel: tpu_custom_call.1
= control target key start
LH: loop header
LB: loop body
LE: loop exit
PB: predicated region body
PF: predicated region fallthrough
CT: control target
= control target key end

     0   :  { %s5647_s0 = inlined_call_operand.hbm [shape: f32[2,32,16], index: 0, kind: input, shape index: {}]   ;;  %s5648_s1 = inlined_call_operand.hbm [shape: f32[2,32,16], index: 1, kind: input, shape index: {}]   ;;  %s5649_s2 = inlined_call_operand.hbm [shape: f32[768,32], index: 2, kind: input, shape index: {}]   ;;  %s5650_s3 = inlined_call_operand.hbm [shape: f32[32,256], index: 3, kind: input, shape index: {}]   ;;  %s5651_s4 = inlined_call_operand.hbm [shape: f32[32,1], index: 4, kind: input, shape index: {}]   ;;  %s5652_s5 = inlined_call_operand.hbm [shape: f32[2,32,16], index: 5, kind: output, shape index: {}]  }
   0x1   :  { %5662 = sst [smem:[#allocation19_spill]] %s5649_s2 }
   0x2   :  { %5663 = sst [smem:[#allocation20_spill]] %s5650_s3 }
   0x3   :  { %5664 = sst [smem:[#allocation21_spill]] %s5651_s4 }
   0x4   :  { %10 = vsyncpa [#allocation3], 0 }
   0x5   :  { %12 = vsyncpa [#allocation3 + $0x1], 0 }
   0x6   :  { %13 = vsyncpa [#allocation6], 0 }
   0x7   :  { %15 = vsyncpa [#allocation6 + $0x1], 0 }
   0x8   :  { %16 = vsyncpa [#allocation9], 0 }
   0x9   :  { %17 = vsyncpa [#allocation4], 0 }
   0xa   :  { %19 = vsyncpa [#allocation4 + $0x1], 0  ;;  %s4902_s18 = smov 0   ;;  %s4904_s19 = smov 0  }
   0xb   :  { %s4906_s20 = smov 0   ;;  %s4908_s21 = smov 0  }
   0xc   :  { %s4910_s22 = smov 0   ;;  %s4912_s23 = smov 0  }
   0xd LB: > { %5665 = sst [smem:[#allocation17_spill]] %s4853_s22  ;;  %s4933_s24 = sadd.s32 4294967295, %s4857_s23   ;;  %s4857_s23 = sphi %s4912_s23, %s25_s23   ;;  %s4853_s22 = sphi %s4910_s22, %s5692_s22   ;;  %s4849_s21 = sphi %s4908_s21, %s5691_s21   ;;  %s4845_s20 = sphi %s4906_s20, %s5695_s20   ;;  %s4841_s19 = sphi %s4904_s19, %s5694_s19   ;;  %s4837_s18 = sphi %s4902_s18, %s5693_s18  }
   0xe   : > { %s3524_s25 = sadd.s32 4294967294, %s4857_s23   ;;  %p57_p0 = scmp.ne.s32.totalorder %s4841_s19, %s4837_s18 }
   0xf   : > { %p5653_p1 = scmp.eq.s32.totalorder %s4933_s24, 0  ;;  %p180_p3 = scmp.eq.s32.totalorder %s3524_s25, 1 }
  0x10   : > { %p3525_p5 = scmp.ge.s32.totalorder %s4857_s23, 1  ;;  %p187_p7 = scmp.lt.s32.totalorder %s4857_s23, 3 }
  0x11   : > { %p4942_p4 = por %p5653_p1, %p57_p0  ;;  %p4947_p6 = por %p180_p3, %p57_p0 }
  0x12   : > { %p4952_p8 = pnand %p3525_p5, %p187_p7  ;;  %s4859_s29 = smov [#allocation7]  }
  0x13   : > { %s5666_s26 = scalar_select %p4942_p4, 1, 0 }
  0x14   : > { %s5667_s27 = scalar_select %p4947_p6, 1, 0 }
  0x15   : > { %s5668_s28 = scalar_select %p4952_p8, 1, 0 }
  0x16   : > { %s199_s30 = sshll.u32 %s4859_s29, 4  ;;  %p4465_p9 = pneg %p4952_p8  ;;  %s4956_s30 = int_to_ptr.vmem [resolvable:$true] %s199_s30 }
  0x17   : > { %s4860_s7 = smov [#allocation8]   ;;  %s5670_s2 = sld [smem:[#allocation19_spill]] }
  0x18   : > { %p4963_p11 = pnand %p4465_p9, %p5653_p1  ;;  %s212_s8 = sshll.u32 %s4860_s7, 4  ;;  %s4967_s8 = int_to_ptr.vmem [resolvable:$true] %s212_s8 }
  0x1a   : > { %p4977_p13 = pneg %p4963_p11 }
  0x1d   : > { %s4619_s11 = scalar_lea.hbm %s5670_s2, 12288 }
  0x1e   : > { %p4620_p12 = scmp.ne.s32.totalorder %s5670_s2, %s4619_s11  ;;  %p4626_p5 = scmp.lt.u32.totalorder %s4619_s11, %s5670_s2 }
  0x20   : > { %p4622_p0 = pnand %p4977_p13, %p4620_p12 }
  0x22   : > { %p4623_p3 = pneg %p4622_p0 }
  0x24   : > { %p4628_p7 = pnand %p4626_p5, %p4623_p3 }
  0x26   : > { %4631 = shalt.err (!%p4628_p7)
}
  0x27   : > { %s4632_s17 = scalar_lea.vmem %s4956_s30, 12288  ;;  %p4640_p2 = scmp.lt.s32.totalorder %s4956_s30, %s4956_s30 }
  0x28   : > { %p4633_p9 = scmp.ne.s32.totalorder %s4956_s30, %s4632_s17  ;;  %p4641_p6 = scmp.lt.s32.totalorder %s4632_s17, %s4632_s17 }
  0x2a   : > { %p4635_p10 = pnand %p4633_p9, %p4977_p13  ;;  %p4642_p12 = por %p4641_p6, %p4640_p2 }
  0x2c   : > { %p4636_p1 = pneg %p4635_p10 }
  0x2e   : > { %p4643_p0 = pnand %p4642_p12, %p4636_p1 }
  0x30   : > { %4646 = shalt.err (!%p4643_p0)
}
  0x31   : > { %s5654_s25 = smov 128   ;;  %s5656_s29 = smov 8  }
  0x32   : > { %4468 = dma.hbm_to_vmem [thread:$0]  (!%p4963_p11), %s5670_s2, 12288, %s4956_s30, [#allocation6], %s5654_s25, %s5654_s25, %s5656_s29  }
  0x33   : > { %s5672_s3 = sld [smem:[#allocation20_spill]] }
  0x39   : > { %s4647_s12 = scalar_lea.hbm %s5672_s3, 1024 }
  0x3a   : > { %p4648_p1 = scmp.ne.s32.totalorder %s5672_s3, %s4647_s12  ;;  %p4654_p10 = scmp.lt.u32.totalorder %s4647_s12, %s5672_s3 }
  0x3c   : > { %p4650_p2 = pnand %p4648_p1, %p4977_p13 }
  0x3e   : > { %p4651_p6 = pneg %p4650_p2 }
  0x40   : > { %p4656_p3 = pnand %p4654_p10, %p4651_p6 }
  0x42   : > { %4659 = shalt.err (!%p4656_p3)
}
  0x43   : > { %s4660_s30 = scalar_lea.vmem %s4967_s8, 1024  ;;  %p4668_p12 = scmp.lt.s32.totalorder %s4967_s8, %s4967_s8 }
  0x44   : > { %p4661_p5 = scmp.ne.s32.totalorder %s4967_s8, %s4660_s30  ;;  %p4669_p0 = scmp.lt.s32.totalorder %s4660_s30, %s4660_s30 }
  0x46   : > { %p4663_p7 = pnand %p4661_p5, %p4977_p13  ;;  %p4670_p1 = por %p4669_p0, %p4668_p12 }
  0x48   : > { %p4664_p9 = pneg %p4663_p7 }
  0x4a   : > { %p4671_p2 = pnand %p4670_p1, %p4664_p9 }
  0x4c   : > { %4674 = shalt.err (!%p4671_p2)
}
  0x4d   : > { %s4863_s7 = smov 256   ;;  %s4864_s9 = smov 16  }
  0x4e   : > { %4471 = dma.hbm_to_vmem [thread:$0]  (!%p4963_p11), %s5672_s3, 1024, %s4967_s8, [#allocation9], %s4863_s7, %s4863_s7, %s4864_s9  }
  0x4f   : > { %s4865_s12 = smov [#allocation10]   ;;  %s5673_s4 = sld [smem:[#allocation21_spill]] }
  0x50   : > { %s225_s13 = sshll.u32 %s4865_s12, 4  ;;  %s226_s13 = int_to_ptr.vmem [resolvable:$true] %s225_s13 }
  0x55   : > { %s4675_s17 = scalar_lea.hbm %s5673_s4, 512 }
  0x56   : > { %p4676_p6 = scmp.ne.s32.totalorder %s5673_s4, %s4675_s17  ;;  %p4682_p5 = scmp.lt.u32.totalorder %s4675_s17, %s5673_s4 }
  0x58   : > { %p4678_p10 = pnand %p4676_p6, %p4977_p13 }
  0x5a   : > { %p4679_p3 = pneg %p4678_p10 }
  0x5c   : > { %p4684_p7 = pnand %p4682_p5, %p4679_p3 }
  0x5e   : > { %4687 = shalt.err (!%p4684_p7)
}
  0x5f   : > { %s4688_s8 = scalar_lea.vmem %s226_s13, 512  ;;  %p4696_p1 = scmp.lt.s32.totalorder %s226_s13, %s226_s13 }
  0x60   : > { %p4689_p9 = scmp.ne.s32.totalorder %s226_s13, %s4688_s8  ;;  %p4697_p2 = scmp.lt.s32.totalorder %s4688_s8, %s4688_s8 }
  0x62   : > { %p4691_p12 = pnand %p4689_p9, %p4977_p13  ;;  %p4698_p4 = por %p4697_p2, %p4696_p1 }
  0x64   : > { %p4692_p0 = pneg %p4691_p12 }
  0x66   : > { %p4699_p8 = pnand %p4698_p4, %p4692_p0 }
  0x68   : > { %4702 = shalt.err (!%p4699_p8)
}
  0x69   : > { %s5674_s25 = smov 8   ;;  %s5675_s7 = smov 128  }
  0x6a   : > { %4474 = dma.hbm_to_vmem [thread:$0]  (!%p4963_p11), %s5673_s4, 512, %s226_s13, [#allocation9], %s5675_s7, %s5675_s7, %s5674_s25  }
  0x6b   : > { %s37_s14 = sadd.s32 1, %s4853_s22  ;;  %s44_s6 = sadd.s32 1, %s4845_s20 }
  0x6c   : > { %p39_p4 = scmp.ge.s32.totalorder %s37_s14, 2  ;;  %p51_p8 = scmp.ne.s32.totalorder %s4845_s20, %s4841_s19 }
  0x6d   : > { %p52_p13 = scmp.eq.s32.totalorder %s4857_s23, 0  ;;  %p5678_p10 = scmp.eq.s32.totalorder %s4933_s24, 1 }
  0x6e   : > { %s5697_s14 = smov (%p39_p4, %s37_s14), 0  ;;  %p4489_p11 = scmp.lt.s32.totalorder %s4857_s23, 2 }
  0x6f   : > { %5676 = sst [smem:[#allocation18_spill]] %s5697_s14  ;;  %p5052_p6 = por %p52_p13, %p51_p8 }
  0x70   : > { %p5058_p3 = por %p5678_p10, %p51_p8  ;;  %s41_s11 = ssub.s32 %s4853_s22, %s5697_s14 }
  0x71   : > { %p42_p5 = scmp.eq.s32.totalorder %s41_s11, 0  ;;  %s239_s12 = sand.u32 1, %s4845_s20  }
  0x72   : > { %s3530_s13 = sshll.u32 %s239_s12, 5  ;;  %s3708_s16 = sshll.u32 %s4853_s22, 9 }
  0x73   : > { %s5067_s15 = scalar_select %p42_p5, %s4845_s20, %s44_s6  }
  0x74   : > { %s5073_s8 = scalar_lea.hbm %s5647_s0, %s3708_s16  ;;  %s243_s2 = scalar_lea.vmem [#allocation2], %s3530_s13 }
  0x75   : > { %s250_s29 = sshll.u32 %s243_s2, 4  ;;  %p5079_p7 = pnand %p4489_p11, %p5052_p6  ;;  %s5075_s29 = int_to_ptr.vmem [resolvable:$true] %s250_s29 }
  0x76   : > { %s5086_s17 = scalar_lea.hbm %s5648_s1, %s3708_s16  ;;  %s264_s30 = scalar_lea.vmem [#allocation5], %s3530_s13 }
  0x77   : > { %s5088_s4 = sshll.u32 %s264_s30, 4  ;;  %s5090_s14 = scalar_lea.sflag [#allocation3], %s239_s12  ;;  %s5122_s4 = int_to_ptr.vmem [resolvable:$true] %s5088_s4 }
  0x78   : > { %s4703_s2 = scalar_lea.hbm %s5073_s8, 512  ;;  %p4705_p12 = pneg %p5079_p7 }
  0x79   : > { %p4704_p9 = scmp.ne.s32.totalorder %s5073_s8, %s4703_s2  ;;  %s4708_s3 = scalar_lea.hbm %s5647_s0, 1024 }
  0x7a   : > { %p4709_p2 = scmp.lt.u32.totalorder %s5073_s8, %s5647_s0  ;;  %p4710_p4 = scmp.lt.u32.totalorder %s4708_s3, %s4703_s2 }
  0x7b   : > { %p4706_p0 = pnand %p4705_p12, %p4704_p9  ;;  %p4712_p13 = scmp.lt.u32.totalorder %s4703_s2, %s5073_s8 }
  0x7c   : > { %p4711_p8 = por %p4710_p4, %p4709_p2 }
  0x7d   : > { %p4707_p1 = pneg %p4706_p0 }
  0x7e   : > { %p4713_p6 = por %p4712_p13, %p4711_p8 }
  0x80   : > { %p4714_p10 = pnand %p4713_p6, %p4707_p1 }
  0x82   : > { %4717 = shalt.err (!%p4714_p10)
}
  0x83   : > { %s4718_s12 = scalar_lea.vmem %s5075_s29, 512  ;;  %s4866_s22 = smov [#allocation2]  }
  0x84   : > { %p4719_p11 = scmp.ne.s32.totalorder %s5075_s29, %s4718_s12  ;;  %s4723_s13 = sshll.u32 %s4866_s22, 4  ;;  %s4724_s13 = int_to_ptr.vmem [resolvable:$false] %s4723_s13 }
  0x85   : > { %s4725_s30 = scalar_lea.vmem %s4724_s13, 1024  ;;  %p4726_p0 = scmp.lt.s32.totalorder %s5075_s29, %s4724_s13 }
  0x86   : > { %p4721_p5 = pnand %p4719_p11, %p4705_p12  ;;  %p4727_p2 = scmp.lt.s32.totalorder %s4725_s30, %s4718_s12 }
  0x88   : > { %p4722_p9 = pneg %p4721_p5  ;;  %p4728_p4 = por %p4727_p2, %p4726_p0 }
  0x8a   : > { %p4729_p8 = pnand %p4728_p4, %p4722_p9 }
  0x8c   : > { %4732 = shalt.err (!%p4729_p8)
}
  0x8d   : > { %4478 = dma.hbm_to_vmem [thread:$0]  (!%p5079_p7), %s5073_s8, 512, %s5075_s29, %s5090_s14, %s5675_s7, %s5675_s7, %s5674_s25  }
  0x8e   : > { %s260_s2 = sand.u32 1, %s4857_s23   ;;  %s4733_s3 = scalar_lea.hbm %s5086_s17, 512 }
  0x8f   : > { %s5125_s9 = scalar_lea.sflag [#allocation6], %s260_s2  ;;  %p4734_p1 = scmp.ne.s32.totalorder %s5086_s17, %s4733_s3 }
  0x90   : > { %s4738_s12 = scalar_lea.hbm %s5648_s1, 1024  ;;  %p4739_p10 = scmp.lt.u32.totalorder %s5086_s17, %s5648_s1 }
  0x91   : > { %p4736_p13 = pnand %p4734_p1, %p4705_p12  ;;  %p4740_p11 = scmp.lt.u32.totalorder %s4738_s12, %s4733_s3 }
  0x92   : > { %p4742_p9 = scmp.lt.u32.totalorder %s4733_s3, %s5086_s17 }
  0x93   : > { %p4737_p6 = pneg %p4736_p13  ;;  %p4741_p5 = por %p4740_p11, %p4739_p10 }
  0x95   : > { %p4743_p0 = por %p4742_p9, %p4741_p5 }
  0x97   : > { %p4744_p2 = pnand %p4743_p0, %p4737_p6 }
  0x99   : > { %4747 = shalt.err (!%p4744_p2)
}
  0x9a   : > { %s4748_s14 = scalar_lea.vmem %s5122_s4, 512  ;;  %s4867_s8 = smov [#allocation5]  }
  0x9b   : > { %p4749_p4 = scmp.ne.s32.totalorder %s5122_s4, %s4748_s14  ;;  %s4753_s29 = sshll.u32 %s4867_s8, 4  ;;  %s4754_s29 = int_to_ptr.vmem [resolvable:$false] %s4753_s29 }
  0x9c   : > { %s4755_s30 = scalar_lea.vmem %s4754_s29, 1024  ;;  %p4756_p13 = scmp.lt.s32.totalorder %s5122_s4, %s4754_s29 }
  0x9d   : > { %p4751_p8 = pnand %p4749_p4, %p4705_p12  ;;  %p4757_p10 = scmp.lt.s32.totalorder %s4755_s30, %s4748_s14 }
  0x9f   : > { %p4752_p1 = pneg %p4751_p8  ;;  %p4758_p11 = por %p4757_p10, %p4756_p13 }
  0xa1   : > { %p4759_p5 = pnand %p4758_p11, %p4752_p1 }
  0xa3   : > { %4762 = shalt.err (!%p4759_p5)
}
  0xa4   : > { %4481 = dma.hbm_to_vmem [thread:$0]  (!%p5079_p7), %s5086_s17, 512, %s5122_s4, %s5125_s9, %s5675_s7, %s5675_s7, %s5674_s25  }
  0xa5   : > { %p5681_p12 = scmp.ne.s32.totalorder %s5668_s28, 0 }
  0xa6   : > { %s5157_s2 = sand.u32 (!%p5681_p12), 1, %s4841_s19   ;;  %p5682_p6 = scmp.ne.s32.totalorder (!%p5681_p12), %s5666_s26, 0 }
  0xa7   : > { %284 = sbr.rel (%p5681_p12) target bundleno = 3251 (0xcb3), region = 40  ;;  %s5160_s3 = sshll.u32 (!%p5681_p12), %s5157_s2, 5 }
  0xa8   : > { %s287_s11 = scalar_lea.sflag (!%p5681_p12), [#allocation3], %s5157_s2  ;;  %s290_s6 = scalar_lea.vmem (!%p5681_p12), [#allocation2], %s5160_s3 }
  0xae   : > { %4816 = dma.done.wait (%p5682_p6), %s287_s11, 512  }
  0xaf   : > { %4818 = vsyncadd (%p5682_p6), %s287_s11, 4294966784  ;;  %s295_s4 = sand.u32 1, %s4933_s24   ;;  %s299_s25 = scalar_lea.vmem [#allocation5], %s5160_s3 }
  0xb0   : > { %s296_s28 = scalar_lea.sflag [#allocation6], %s295_s4 }
  0xb1   : > { %4820 = dma.done.wait (%p5682_p6), %s296_s28, 512  }
  0xb2   : > { %4822 = vsyncadd (%p5682_p6), %s296_s28, 4294966784  ;;  %p5683_p7 = scmp.eq.s32.totalorder %s4933_s24, 0 }
  0xb4   : > { %4824 = dma.done.wait (%p5683_p7), [#allocation6], 12288   ;;  %p5684_p9 = pmov %p5683_p7 }
  0xb5   : > { %p5685_p0 = pmov %p5683_p7 }
  0xb6   : > { %4826 = vsyncadd (%p5684_p9), [#allocation6], 4294955008 }
  0xb7   : > { %4828 = dma.done.wait (%p5685_p0), [#allocation9], 1536   ;;  %p5686_p2 = pmov %p5685_p0 }
  0xb8   : > { %vm447_vm0 = vcmask 261120   ;;  %v439_v0 = vld [vmem:[%s290_s6] sm:$0xff]  ;;  %v440_v1 = vld [vmem:[%s290_s6 + $0x8] sm:$0xff]  ;;  %v441_v2 = vld [vmem:[%s290_s6 + $0x10] sm:$0xff]  ;;  %vm1459_vm1 = vcmask 130048   ;;  %s342_s24 = scalar_lea.vmem [#allocation11], %s5160_s3 }
  0xb9   : > { %4830 = vsyncadd (%p5686_p2), [#allocation9], 4294965760  ;;  %v4283_v3 = vpack.c.bf16 %v440_v1, %v439_v0  ;;  %v442_v4 = vld [vmem:[%s290_s6 + $0x18] sm:$0xff]  ;;  %v429_v5 = vld [vmem:[#allocation7 + $0x2b0] sm:$0xff]  ;;  %s3387_s26 = sshll.u32 %s342_s24, 4  ;;  %s3710_s7 = sshll.u32 %s4849_s21, 9  ;;  %s5591_s26 = int_to_ptr.vmem [resolvable:$true] %s3387_s26 }
  0xba   : > { %v4287_v6 = vpack.c.bf16 %v442_v4, %v441_v2  ;;  %4044 = vmatprep.mubr.msk.f32.mxu1 %vm447_vm0, %v429_v5  ;;  %v443_v7 = vld [vmem:[%s299_s25] sm:$0xff]  ;;  %v444_v8 = vld [vmem:[%s299_s25 + $0x8] sm:$0xff]  ;;  %v445_v10 = vld [vmem:[%s299_s25 + $0x10] sm:$0xff]  ;;  %s5597_s16 = scalar_lea.hbm %s5652_s5, %s3710_s7  ;;  %s3373_s12 = scalar_lea.sflag [#allocation4], %s5157_s2 }
  0xbb   : > { %4443 = vmatprep.subr.bf16.mxu1 %v4283_v3  ;;  %4284 = vmatprep.subr.bf16.mxu0 %v4283_v3  ;;  %v4291_v9 = vpack.c.bf16 %v444_v8, %v443_v7  ;;  %v446_v11 = vld [vmem:[%s299_s25 + $0x18] sm:$0xff]  ;;  %v375_v12 = vld [vmem:[#allocation7 + $0x100] sm:$0xff]  ;;  %v376_v14 = vld [vmem:[#allocation7 + $0x108] sm:$0xff]  ;;  %s4763_s21 = scalar_lea.vmem %s5591_s26, 512  ;;  %s4869_s22 = smov [#allocation11]  }
  0xbc   : > { %4445 = vmatpush3.bf16.msra.mxu1 %v4283_v3  ;;  %4286 = vmatpush3.bf16.msra.mxu0 %v4283_v3  ;;  %v430_v13 = vld [vmem:[#allocation7 + $0x2b8] sm:$0xff]  ;;  %v431_v15 = vld [vmem:[#allocation7 + $0x2c0] sm:$0xff]  ;;  %v4295_v16 = vpack.c.bf16 %v446_v11, %v445_v10  ;;  %v377_v17 = vld [vmem:[#allocation7 + $0x110] sm:$0xff]  ;;  %p4764_p4 = scmp.ne.s32.totalorder %s5591_s26, %s4763_s21  ;;  %s4767_s13 = sshll.u32 %s4869_s22, 4  ;;  %s4768_s13 = int_to_ptr.vmem [resolvable:$false] %s4767_s13 }
  0xbd   : > { %4444 = vmatprep.subr.bf16.mxu1 %v4287_v6  ;;  %4288 = vmatprep.subr.bf16.mxu0 %v4287_v6  ;;  %v432_v18 = vld [vmem:[#allocation7 + $0x2c8] sm:$0xff]  ;;  %v378_v19 = vld [vmem:[#allocation7 + $0x118] sm:$0xff]  ;;  %v433_v20 = vld [vmem:[#allocation7 + $0x2d0] sm:$0xff]  ;;  %s4769_s14 = scalar_lea.vmem %s4768_s13, 1024  ;;  %p4770_p13 = scmp.lt.s32.totalorder %s5591_s26, %s4768_s13 }
  0xbe   : > { %3963 = vmatprep.mubr.msk.f32.mxu0 %vm447_vm0, %v375_v12  ;;  %v434_v21 = vld [vmem:[#allocation7 + $0x2d8] sm:$0xff]  ;;  %v435_v22 = vld [vmem:[#allocation7 + $0x2e0] sm:$0xff]  ;;  %v436_v23 = vld [vmem:[#allocation7 + $0x2e8] sm:$0xff]  ;;  %p4765_p8 = pnand %p4764_p4, %p5058_p3  ;;  %p4771_p10 = scmp.lt.s32.totalorder %s4769_s14, %s4763_s21 }
  0xbf   : > { %v437_v24 = vld [vmem:[#allocation7 + $0x2f0] sm:$0xff]  ;;  %v438_v25 = vld [vmem:[#allocation7 + $0x2f8] sm:$0xff]  ;;  %v343_v26 = vld [vmem:[#allocation7] sm:$0xff] }
  0xc0   : > { %4446 = vmatpush3.bf16.msra.mxu1 %v4287_v6  ;;  %4290 = vmatpush3.bf16.msra.mxu0 %v4287_v6  ;;  %v344_v27 = vld [vmem:[#allocation7 + $0x8] sm:$0xff]  ;;  %v345_v28 = vld [vmem:[#allocation7 + $0x10] sm:$0xff]  ;;  %v346_v29 = vld [vmem:[#allocation7 + $0x18] sm:$0xff]  ;;  %p4766_p1 = pneg %p4765_p8  ;;  %p4772_p11 = por %p4771_p10, %p4770_p13 }
  0xc1   : > { %4292 = vmatprep.subr.bf16.mxu1 %v4291_v9  ;;  %v347_v30 = vld [vmem:[#allocation7 + $0x20] sm:$0xff]  ;;  %v348_v31 = vld [vmem:[#allocation7 + $0x28] sm:$0xff]  ;;  %v349_v32 = vld [vmem:[#allocation7 + $0x30] sm:$0xff] }
  0xc2   : > { %v350_v33 = vld [vmem:[#allocation7 + $0x38] sm:$0xff]  ;;  %v351_v34 = vld [vmem:[#allocation7 + $0x40] sm:$0xff]  ;;  %v352_v35 = vld [vmem:[#allocation7 + $0x48] sm:$0xff]  ;;  %p4773_p5 = pnand %p4772_p11, %p4766_p1 }
  0xc3   : > { %4045 = vmatmul.mubr.msk.f32.vlgmr.msra.gmra.mrb[0].mxu1 %vm447_vm0, %v430_v13  ;;  %3964 = vmatmul.mubr.msk.f32.vlgmr.msra.gmra.mrb[0].mxu0 %vm447_vm0, %v376_v14  ;;  %v353_v36 = vld [vmem:[#allocation7 + $0x50] sm:$0xff]  ;;  %v354_v37 = vld [vmem:[#allocation7 + $0x58] sm:$0xff]  ;;  %v355_v38 = vld [vmem:[#allocation7 + $0x60] sm:$0xff] }
  0xc4   : > { %4294 = vmatpush3.bf16.msra.mxu1 %v4291_v9  ;;  %4047 = vmatprep.mubr.msk.f32.mxu1 %vm447_vm0, %v431_v15  ;;  %v356_v39 = vld [vmem:[#allocation7 + $0x68] sm:$0xff]  ;;  %v357_v40 = vld [vmem:[#allocation7 + $0x70] sm:$0xff]  ;;  %v358_v41 = vld [vmem:[#allocation7 + $0x78] sm:$0xff] }
  0xc5   : > { %4296 = vmatprep.subr.bf16.mxu1 %v4295_v16  ;;  %3966 = vmatprep.mubr.msk.f32.mxu0 %vm447_vm0, %v377_v17  ;;  %v359_v42 = vld [vmem:[#allocation7 + $0x80] sm:$0xff]  ;;  %v360_v43 = vld [vmem:[#allocation7 + $0x88] sm:$0xff]  ;;  %v361_v44 = vld [vmem:[#allocation7 + $0x90] sm:$0xff] }
  0xc6   : > { %v362_v45 = vld [vmem:[#allocation7 + $0x98] sm:$0xff]  ;;  %v363_v46 = vld [vmem:[#allocation7 + $0xa0] sm:$0xff]  ;;  %v364_v47 = vld [vmem:[#allocation7 + $0xa8] sm:$0xff] }
  0xc7   : > { %4048 = vmatmul.mubr.msk.f32.gmra.mrb[2].mxu1 %vm447_vm0, %v432_v18  ;;  %3967 = vmatmul.mubr.msk.f32.gmra.mrb[2].mxu0 %vm447_vm0, %v378_v19  ;;  %v365_v48 = vld [vmem:[#allocation7 + $0xb0] sm:$0xff]  ;;  %v366_v49 = vld [vmem:[#allocation7 + $0xb8] sm:$0xff]  ;;  %v367_v50 = vld [vmem:[#allocation7 + $0xc0] sm:$0xff] }
  0xc8   : > { %4050 = vmatprep.mubr.msk.f32.mxu1 %vm447_vm0, %v433_v20  ;;  %4298 = vmatpush3.bf16.msra.mxu1 %v4295_v16  ;;  %v368_v51 = vld [vmem:[#allocation7 + $0xc8] sm:$0xff]  ;;  %v369_v52 = vld [vmem:[#allocation7 + $0xd0] sm:$0xff]  ;;  %v370_v53 = vld [vmem:[#allocation7 + $0xd8] sm:$0xff] }
  0xc9   : > { %v371_v54 = vld [vmem:[#allocation7 + $0xe0] sm:$0xff]  ;;  %v372_v55 = vld [vmem:[#allocation7 + $0xe8] sm:$0xff]  ;;  %v373_v56 = vld [vmem:[#allocation7 + $0xf0] sm:$0xff] }
  0xca   : > { %v374_v57 = vld [vmem:[#allocation7 + $0xf8] sm:$0xff]  ;;  %vm5322_vm2 = vmpackc.low %vm1459_vm1, %vm1459_vm1 }
  0xcb   : > { %4051 = vmatmul.mubr.msk.f32.gmra.mrb[4].mxu1 %vm447_vm0, %v434_v21 }
  0xcc   : > { %4053 = vmatprep.mubr.msk.f32.mxu1 %vm447_vm0, %v435_v22 }
  0xcf   : > { %4054 = vmatmul.mubr.msk.f32.gmra.mrb[6].mxu1 %vm447_vm0, %v436_v23 }
  0xd0   : > { %4056 = vmatprep.mubr.msk.f32.mxu1 %vm447_vm0, %v437_v24 }
  0xd3   : > { %4057 = vmatmul.mubr.msk.f32.gmra.mrb[8].mxu1 %vm447_vm0, %v438_v25 }
  0xd4   : > { %4067 = vmatprep.mubr.msk.f32.mxu1 %vm447_vm0, %v343_v26 }
  0xd7   : > { %4068 = vmatmul.mubr.msk.f32.vlgmr.msra.gmra.mrb[10].mxu1 %vm447_vm0, %v344_v27 }
  0xd8   : > { %4070 = vmatprep.mubr.msk.f32.mxu1 %vm447_vm0, %v345_v28 }
  0xdb   : > { %4071 = vmatmul.mubr.msk.f32.gmra.mrb[12].mxu1 %vm447_vm0, %v346_v29 }
  0xdc   : > { %4073 = vmatprep.mubr.msk.f32.mxu1 %vm447_vm0, %v347_v30 }
  0xdf   : > { %4074 = vmatmul.mubr.msk.f32.gmra.mrb[14].mxu1 %vm447_vm0, %v348_v31 }
  0xe0   : > { %4076 = vmatprep.mubr.msk.f32.mxu1 %vm447_vm0, %v349_v32 }
  0xe3   : > { %4077 = vmatmul.mubr.msk.f32.gmra.mrb[16].mxu1 %vm447_vm0, %v350_v33 }
  0xe4   : > { %4079 = vmatprep.mubr.msk.f32.mxu1 %vm447_vm0, %v351_v34 }
  0xe7   : > { %4080 = vmatmul.mubr.msk.f32.gmra.mrb[18].mxu1 %vm447_vm0, %v352_v35 }
  0xe8   : > { %4082 = vmatprep.mubr.msk.f32.mxu1 %vm447_vm0, %v353_v36 }
  0xeb   : > { %4083 = vmatmul.mubr.msk.f32.gmra.mrb[20].mxu1 %vm447_vm0, %v354_v37 }
  0xec   : > { %4085 = vmatprep.mubr.msk.f32.mxu1 %vm447_vm0, %v355_v38 }
  0xef   : > { %4086 = vmatmul.mubr.msk.f32.gmra.mrb[22].mxu1 %vm447_vm0, %v356_v39 }
  0xf0   : > { %4088 = vmatprep.mubr.msk.f32.mxu1 %vm447_vm0, %v357_v40 }
  0xf3   : > { %4089 = vmatmul.mubr.msk.f32.gmra.mrb[24].mxu1 %vm447_vm0, %v358_v41 }
  0xf4   : > { %4091 = vmatprep.mubr.msk.f32.mxu1 %vm447_vm0, %v359_v42 }
  0xf7   : > { %4092 = vmatmul.mubr.msk.f32.gmra.mrb[26].mxu1 %vm447_vm0, %v360_v43 }
  0xf8   : > { %4094 = vmatprep.mubr.msk.f32.mxu1 %vm447_vm0, %v361_v44  ;;  %v379_v44 = vld [vmem:[#allocation7 + $0x120] sm:$0xff] }
  0xf9   : > { %3969 = vmatprep.mubr.msk.f32.mxu0 %vm447_vm0, %v379_v44 }
  0xfb   : > { %4095 = vmatmul.mubr.msk.f32.gmra.mrb[28].mxu1 %vm447_vm0, %v362_v45  ;;  %v380_v45 = vld [vmem:[#allocation7 + $0x128] sm:$0xff] }
  0xfc   : > { %4097 = vmatprep.mubr.msk.f32.mxu1 %vm447_vm0, %v363_v46  ;;  %v381_v46 = vld [vmem:[#allocation7 + $0x130] sm:$0xff]  ;;  %3970 = vmatmul.mubr.msk.f32.gmra.mrb[4].mxu0 %vm447_vm0, %v380_v45 }
  0xfd   : > { %3972 = vmatprep.mubr.msk.f32.mxu0 %vm447_vm0, %v381_v46 }
  0xff   : > { %4098 = vmatmul.mubr.msk.f32.gmra.mrb[30].mxu1 %vm447_vm0, %v364_v47  ;;  %v382_v47 = vld [vmem:[#allocation7 + $0x138] sm:$0xff] }
 0x100   : > { %4100 = vmatprep.mubr.msk.f32.mxu1 %vm447_vm0, %v365_v48  ;;  %v383_v48 = vld [vmem:[#allocation7 + $0x140] sm:$0xff]  ;;  %3973 = vmatmul.mubr.msk.f32.gmra.mrb[6].mxu0 %vm447_vm0, %v382_v47 }
 0x101   : > { %3975 = vmatprep.mubr.msk.f32.mxu0 %vm447_vm0, %v383_v48 }
 0x103   : > { %4101 = vmatmul.mubr.msk.f32.gmra.mrb[32].mxu1 %vm447_vm0, %v366_v49  ;;  %v384_v49 = vld [vmem:[#allocation7 + $0x148] sm:$0xff] }
 0x104   : > { %4103 = vmatprep.mubr.msk.f32.mxu1 %vm447_vm0, %v367_v50  ;;  %v385_v50 = vld [vmem:[#allocation7 + $0x150] sm:$0xff]  ;;  %3976 = vmatmul.mubr.msk.f32.gmra.mrb[8].mxu0 %vm447_vm0, %v384_v49 }
 0x105   : > { %3978 = vmatprep.mubr.msk.f32.mxu0 %vm447_vm0, %v385_v50 }
 0x107   : > { %4104 = vmatmul.mubr.msk.f32.gmra.mrb[34].mxu1 %vm447_vm0, %v368_v51  ;;  %v386_v51 = vld [vmem:[#allocation7 + $0x158] sm:$0xff] }
 0x108   : > { %4106 = vmatprep.mubr.msk.f32.mxu1 %vm447_vm0, %v369_v52  ;;  %v387_v52 = vld [vmem:[#allocation7 + $0x160] sm:$0xff]  ;;  %3979 = vmatmul.mubr.msk.f32.gmra.mrb[10].mxu0 %vm447_vm0, %v386_v51 }
 0x109   : > { %3981 = vmatprep.mubr.msk.f32.mxu0 %vm447_vm0, %v387_v52 }
 0x10b   : > { %4107 = vmatmul.mubr.msk.f32.gmra.mrb[36].mxu1 %vm447_vm0, %v370_v53  ;;  %v388_v53 = vld [vmem:[#allocation7 + $0x168] sm:$0xff] }
 0x10c   : > { %4109 = vmatprep.mubr.msk.f32.mxu1 %vm447_vm0, %v371_v54  ;;  %v389_v54 = vld [vmem:[#allocation7 + $0x170] sm:$0xff]  ;;  %3982 = vmatmul.mubr.msk.f32.gmra.mrb[12].mxu0 %vm447_vm0, %v388_v53 }
 0x10d   : > { %3984 = vmatprep.mubr.msk.f32.mxu0 %vm447_vm0, %v389_v54 }
 0x10f   : > { %4110 = vmatmul.mubr.msk.f32.gmra.mrb[38].mxu1 %vm447_vm0, %v372_v55  ;;  %v390_v55 = vld [vmem:[#allocation7 + $0x178] sm:$0xff] }
 0x110   : > { %4112 = vmatprep.mubr.msk.f32.mxu1 %vm447_vm0, %v373_v56  ;;  %v391_v56 = vld [vmem:[#allocation7 + $0x180] sm:$0xff]  ;;  %3985 = vmatmul.mubr.msk.f32.gmra.mrb[14].mxu0 %vm447_vm0, %v390_v55 }
 0x111   : > { %3987 = vmatprep.mubr.msk.f32.mxu0 %vm447_vm0, %v391_v56 }
 0x113   : > { %4113 = vmatmul.mubr.msk.f32.gmra.mrb[40].mxu1 %vm447_vm0, %v374_v57  ;;  %v392_v57 = vld [vmem:[#allocation7 + $0x188] sm:$0xff] }
 0x114   : > { %3988 = vmatmul.mubr.msk.f32.gmra.mrb[16].mxu0 %vm447_vm0, %v392_v57 }
 0x196   : > { %v5228_v58 = vpop.f32.mrb[0].mxu1  ;;  %v3965_v59 = vpop.f32.mrb[0].mxu0 }
 0x197   : > { %v5230_v60 = vpop.f32.mrb[1].mxu1  ;;  %v706_v61 = vpop.f32.mrb[1].mxu0 }
 0x198   : > { %v4299_v62 = vpack.c.bf16 %v3965_v59, %v706_v61  ;;  %v393_v59 = vld [vmem:[#allocation7 + $0x190] sm:$0xff]  ;;  %v394_v61 = vld [vmem:[#allocation7 + $0x198] sm:$0xff] }
 0x199   : > { %3990 = vmatprep.mubr.msk.f32.mxu0 %vm447_vm0, %v393_v59 }
 0x19a   : > { %v5232_v63 = vpop.f32.mrb[2].mxu1  ;;  %4300 = vmatprep.subr.bf16.mxu1 %v4299_v62  ;;  %v3968_v0 = vpop.f32.mrb[2].mxu0  ;;  %3991 = vmatmul.mubr.msk.f32.gmra.mrb[18].mxu0 %vm447_vm0, %v394_v61 }
 0x19b   : > { %v5234_v1 = vpop.f32.mrb[3].mxu1  ;;  %4302 = vmatpush3.bf16.msra.mxu1 %v4299_v62  ;;  %v716_v2 = vpop.f32.mrb[3].mxu0  ;;  %v395_v62 = vld [vmem:[#allocation7 + $0x1a0] sm:$0xff] }
 0x19c   : > { %v4303_v3 = vpack.c.bf16 %v3968_v0, %v716_v2  ;;  %3993 = vmatprep.mubr.msk.f32.mxu0 %vm447_vm0, %v395_v62  ;;  %v396_v0 = vld [vmem:[#allocation7 + $0x1a8] sm:$0xff]  ;;  %v397_v2 = vld [vmem:[#allocation7 + $0x1b0] sm:$0xff] }
 0x19e   : > { %v5236_v4 = vpop.f32.mrb[4].mxu1  ;;  %4304 = vmatprep.subr.bf16.mxu1 %v4303_v3  ;;  %3994 = vmatmul.mubr.msk.f32.gmra.mrb[20].mxu0 %vm447_vm0, %v396_v0 }
 0x19f   : > { %v5238_v5 = vpop.f32.mrb[5].mxu1  ;;  %4306 = vmatpush3.bf16.msra.mxu1 %v4303_v3  ;;  %3996 = vmatprep.mubr.msk.f32.mxu0 %vm447_vm0, %v397_v2  ;;  %v398_v3 = vld [vmem:[#allocation7 + $0x1b8] sm:$0xff] }
 0x1a2   : > { %v5240_v6 = vpop.f32.mrb[6].mxu1  ;;  %3997 = vmatmul.mubr.msk.f32.gmra.mrb[22].mxu0 %vm447_vm0, %v398_v3 }
 0x1a3   : > { %v5242_v7 = vpop.f32.mrb[7].mxu1 }
 0x1a6   : > { %v5244_v8 = vpop.f32.mrb[8].mxu1 }
 0x1a7   : > { %v5246_v9 = vpop.f32.mrb[9].mxu1 }
 0x1aa   : > { %v4069_v10 = vpop.f32.mrb[10].mxu1 }
 0x1ab   : > { %v1187_v11 = vpop.f32.mrb[11].mxu1 }
 0x1ac   : > { %1346 = vxpose.xlu0.b32.start [1/4] (short) (narrow) %v1187_v11, 16  ;;  %v400_v11 = vld [vmem:[#allocation7 + $0x1c8] sm:$0xff] }
 0x1ae   : > { %v4072_v12 = vpop.f32.mrb[12].mxu1 }
 0x1af   : > { %v1197_v13 = vpop.f32.mrb[13].mxu1 }
 0x1b0   : > { %1347 = vxpose.xlu0.b32.cont [2/4] (short) (narrow) %v4069_v10, 16  ;;  %v399_v10 = vld [vmem:[#allocation7 + $0x1c0] sm:$0xff] }
 0x1b1   : > { %3999 = vmatprep.mubr.msk.f32.mxu0 %vm447_vm0, %v399_v10 }
 0x1b2   : > { %v4075_v14 = vpop.f32.mrb[14].mxu1  ;;  %4000 = vmatmul.mubr.msk.f32.gmra.mrb[24].mxu0 %vm447_vm0, %v400_v11 }
 0x1b3   : > { %v1207_v15 = vpop.f32.mrb[15].mxu1 }
 0x1b4   : > { %1348 = vxpose.xlu0.b32.cont [3/4] (short) (narrow) %v1197_v13, 16  ;;  %v402_v13 = vld [vmem:[#allocation7 + $0x1d8] sm:$0xff] }
 0x1b6   : > { %v4078_v16 = vpop.f32.mrb[16].mxu1 }
 0x1b7   : > { %v1217_v17 = vpop.f32.mrb[17].mxu1 }
 0x1b8   : > { %1349 = vxpose.xlu0.b32.end [4/4] (short) (narrow) %v4072_v12, 16  ;;  %v401_v12 = vld [vmem:[#allocation7 + $0x1d0] sm:$0xff] }
 0x1b9   : > { %4002 = vmatprep.mubr.msk.f32.mxu0 %vm447_vm0, %v401_v12 }
 0x1ba   : > { %v4081_v18 = vpop.f32.mrb[18].mxu1  ;;  %4003 = vmatmul.mubr.msk.f32.gmra.mrb[26].mxu0 %vm447_vm0, %v402_v13 }
 0x1bb   : > { %v1227_v19 = vpop.f32.mrb[19].mxu1 }
 0x1bc   : > { %1585 = vxpose.xlu0.b32.start [1/4] (short) (narrow) %v1207_v15, 16  ;;  %v404_v15 = vld [vmem:[#allocation7 + $0x1e8] sm:$0xff] }
 0x1be   : > { %v4084_v20 = vpop.f32.mrb[20].mxu1 }
 0x1bf   : > { %v1237_v21 = vpop.f32.mrb[21].mxu1 }
 0x1c0   : > { %1586 = vxpose.xlu0.b32.cont [2/4] (short) (narrow) %v4075_v14, 16  ;;  %v403_v14 = vld [vmem:[#allocation7 + $0x1e0] sm:$0xff] }
 0x1c1   : > { %4005 = vmatprep.mubr.msk.f32.mxu0 %vm447_vm0, %v403_v14 }
 0x1c2   : > { %v4087_v22 = vpop.f32.mrb[22].mxu1  ;;  %4006 = vmatmul.mubr.msk.f32.gmra.mrb[28].mxu0 %vm447_vm0, %v404_v15 }
 0x1c3   : > { %v1247_v23 = vpop.f32.mrb[23].mxu1 }
 0x1c4   : > { %1587 = vxpose.xlu0.b32.cont [3/4] (short) (narrow) %v1217_v17, 16  ;;  %v406_v17 = vld [vmem:[#allocation7 + $0x1f8] sm:$0xff] }
 0x1c6   : > { %v4090_v24 = vpop.f32.mrb[24].mxu1 }
 0x1c7   : > { %v1257_v25 = vpop.f32.mrb[25].mxu1 }
 0x1c8   : > { %1588 = vxpose.xlu0.b32.end [4/4] (short) (narrow) %v4078_v16, 16  ;;  %v405_v16 = vld [vmem:[#allocation7 + $0x1f0] sm:$0xff] }
 0x1c9   : > { %4008 = vmatprep.mubr.msk.f32.mxu0 %vm447_vm0, %v405_v16 }
 0x1ca   : > { %v5248_v26 = vpop.f32.mrb[26].mxu1  ;;  %4009 = vmatmul.mubr.msk.f32.gmra.mrb[30].mxu0 %vm447_vm0, %v406_v17 }
 0x1cb   : > { %v5250_v27 = vpop.f32.mrb[27].mxu1 }
 0x1cc   : > { %1823 = vxpose.xlu0.b32.start [1/4] (short) (narrow) %v1227_v19, 16  ;;  %v408_v19 = vld [vmem:[#allocation7 + $0x208] sm:$0xff] }
 0x1ce   : > { %v5252_v28 = vpop.f32.mrb[28].mxu1 }
 0x1cf   : > { %v5254_v29 = vpop.f32.mrb[29].mxu1 }
 0x1d0   : > { %1824 = vxpose.xlu0.b32.cont [2/4] (short) (narrow) %v4081_v18, 16  ;;  %v407_v18 = vld [vmem:[#allocation7 + $0x200] sm:$0xff] }
 0x1d1   : > { %4011 = vmatprep.mubr.msk.f32.mxu0 %vm447_vm0, %v407_v18 }
 0x1d2   : > { %v4099_v31 = vpop.f32.mrb[30].mxu1  ;;  %4012 = vmatmul.mubr.msk.f32.gmra.mrb[32].mxu0 %vm447_vm0, %v408_v19 }
 0x1d3   : > { %v1287_v32 = vpop.f32.mrb[31].mxu1 }
 0x1d4   : > { %1825 = vxpose.xlu0.b32.cont [3/4] (short) (narrow) %v1237_v21, 16  ;;  %v410_v21 = vld [vmem:[#allocation7 + $0x218] sm:$0xff] }
 0x1d6   : > { %v4102_v34 = vpop.f32.mrb[32].mxu1 }
 0x1d7   : > { %v1297_v35 = vpop.f32.mrb[33].mxu1 }
 0x1d8   : > { %1826 = vxpose.xlu0.b32.end [4/4] (short) (narrow) %v4084_v20, 16  ;;  %v409_v20 = vld [vmem:[#allocation7 + $0x210] sm:$0xff] }
 0x1d9   : > { %4014 = vmatprep.mubr.msk.f32.mxu0 %vm447_vm0, %v409_v20 }
 0x1da   : > { %v4105_v36 = vpop.f32.mrb[34].mxu1  ;;  %4015 = vmatmul.mubr.msk.f32.gmra.mrb[34].mxu0 %vm447_vm0, %v410_v21 }
 0x1db   : > { %v1307_v37 = vpop.f32.mrb[35].mxu1 }
 0x1dc   : > { %2061 = vxpose.xlu0.b32.start [1/4] (short) (narrow) %v1247_v23, 16 }
 0x1de   : > { %v4108_v38 = vpop.f32.mrb[36].mxu1 }
 0x1df   : > { %v1317_v39 = vpop.f32.mrb[37].mxu1 }
 0x1e0   : > { %2062 = vxpose.xlu0.b32.cont [2/4] (short) (narrow) %v4087_v22, 16 }
 0x1e2   : > { %v4111_v40 = vpop.f32.mrb[38].mxu1 }
 0x1e3   : > { %v1327_v41 = vpop.f32.mrb[39].mxu1 }
 0x1e4   : > { %2063 = vxpose.xlu0.b32.cont [3/4] (short) (narrow) %v1257_v25, 16 }
 0x1e6   : > { %v4114_v42 = vpop.f32.mrb[40].mxu1 }
 0x1e7   : > { %v1337_v43 = vpop.f32.mrb[41].mxu1 }
 0x1e8   : > { %2064 = vxpose.xlu0.b32.end [4/4] (short) (narrow) %v4090_v24, 16 }
 0x1ec   : > { %2537 = vxpose.xlu0.b32.start [1/4] (short) (narrow) %v1287_v32, 16 }
 0x1f0   : > { %2538 = vxpose.xlu0.b32.cont [2/4] (short) (narrow) %v4099_v31, 16 }
 0x1f4   : > { %2539 = vxpose.xlu0.b32.cont [3/4] (short) (narrow) %v1297_v35, 16 }
 0x1f8   : > { %2540 = vxpose.xlu0.b32.end [4/4] (short) (narrow) %v4102_v34, 16 }
 0x1fc   : > { %2775 = vxpose.xlu0.b32.start [1/4] (short) (narrow) %v1307_v37, 16 }
 0x200   : > { %2776 = vxpose.xlu0.b32.cont [2/4] (short) (narrow) %v4105_v36, 16 }
 0x204   : > { %2777 = vxpose.xlu0.b32.cont [3/4] (short) (narrow) %v1317_v39, 16 }
 0x208   : > { %2778 = vxpose.xlu0.b32.end [4/4] (short) (narrow) %v4108_v38, 16 }
 0x20c   : > { %3013 = vxpose.xlu0.b32.start [1/4] (short) (narrow) %v1327_v41, 16 }
 0x210   : > { %3014 = vxpose.xlu0.b32.cont [2/4] (short) (narrow) %v4111_v40, 16 }
 0x214   : > { %3015 = vxpose.xlu0.b32.cont [3/4] (short) (narrow) %v1337_v43, 16 }
 0x218   : > { %3016 = vxpose.xlu0.b32.end [4/4] (short) (narrow) %v4114_v42, 16 }
 0x22c   : > { %v1362_v30 = vpop.trf.xlu0 }
 0x22d   : > { %4123 = vmatprep.mubr.msk.f32.mxu1 %vm447_vm0, %v1362_v30  ;;  %v3971_v30 = vpop.f32.mrb[4].mxu0 }
 0x22e   : > { %v726_v31 = vpop.f32.mrb[5].mxu0 }
 0x22f   : > { %v5292_v32 = vpack.c.bf16 %v3971_v30, %v726_v31 }
 0x230   : > { %v1363_v33 = vpop.trf.xlu0 }
 0x231   : > { %4124 = vmatmul.mubr.msk.f32.vlgmr.msra.gmra.mrb[42].mxu1 %vm447_vm0, %v1363_v33  ;;  %v3974_v33 = vpop.f32.mrb[6].mxu0 }
 0x232   : > { %v736_v34 = vpop.f32.mrb[7].mxu0 }
 0x233   : > { %v5294_v35 = vpack.c.bf16 %v3974_v33, %v736_v34  ;;  %v3977_v36 = vpop.f32.mrb[8].mxu0 }
 0x234   : > { %v746_v37 = vpop.f32.mrb[9].mxu0 }
 0x235   : > { %v5296_v38 = vpack.c.bf16 %v3977_v36, %v746_v37  ;;  %v3980_v39 = vpop.f32.mrb[10].mxu0 }
 0x236   : > { %v756_v40 = vpop.f32.mrb[11].mxu0 }
 0x237   : > { %v5298_v41 = vpack.c.bf16 %v3980_v39, %v756_v40  ;;  %v3983_v42 = vpop.f32.mrb[12].mxu0 }
 0x238   : > { %v766_v43 = vpop.f32.mrb[13].mxu0 }
 0x239   : > { %v5300_v44 = vpack.c.bf16 %v3983_v42, %v766_v43  ;;  %v3986_v45 = vpop.f32.mrb[14].mxu0 }
 0x23a   : > { %v776_v46 = vpop.f32.mrb[15].mxu0 }
 0x23b   : > { %v5302_v47 = vpack.c.bf16 %v3986_v45, %v776_v46  ;;  %v3989_v48 = vpop.f32.mrb[16].mxu0 }
 0x23c   : > { %v786_v49 = vpop.f32.mrb[17].mxu0 }
 0x23d   : > { %v4355_v50 = vpack.c.bf16 %v3989_v48, %v786_v49 }
 0x23f   : > { %4356 = vmatprep.subr.bf16.mxu0 %v4355_v50 }
 0x240   : > { %4358 = vmatpush3.bf16.msra.mxu0 %v4355_v50  ;;  %v1601_v50 = vpop.trf.xlu0 }
 0x26d   : > { %v3992_v51 = vpop.f32.mrb[18].mxu0 }
 0x26e   : > { %v796_v52 = vpop.f32.mrb[19].mxu0 }
 0x26f   : > { %v4359_v53 = vpack.c.bf16 %v3992_v51, %v796_v52  ;;  %v1602_v51 = vpop.trf.xlu0  ;;  %v411_v52 = vld [vmem:[#allocation7 + $0x220] sm:$0xff] }
 0x270   : > { %4017 = vmatprep.mubr.msk.f32.mxu0 %vm447_vm0, %v411_v52  ;;  %v417_v52 = vld [vmem:[#allocation7 + $0x250] sm:$0xff] }
 0x271   : > { %4360 = vmatprep.subr.bf16.mxu0 %v4359_v53  ;;  %v3995_v54 = vpop.f32.mrb[20].mxu0 }
 0x272   : > { %4362 = vmatpush3.bf16.msra.mxu0 %v4359_v53  ;;  %v806_v11 = vpop.f32.mrb[21].mxu0  ;;  %v412_v53 = vld [vmem:[#allocation7 + $0x228] sm:$0xff] }
 0x273   : > { %v5306_v12 = vpack.c.bf16 %v3995_v54, %v806_v11  ;;  %v413_v54 = vld [vmem:[#allocation7 + $0x230] sm:$0xff]  ;;  %4018 = vmatmul.mubr.msk.f32.gmra.mrb[36].mxu0 %vm447_vm0, %v412_v53 }
 0x274   : > { %4020 = vmatprep.mubr.msk.f32.mxu0 %vm447_vm0, %v413_v54 }
 0x275   : > { %v3998_v13 = vpop.f32.mrb[22].mxu0  ;;  %4370 = vmatprep.subr.bf16.mxu0 %v5306_v12 }
 0x276   : > { %v816_v14 = vpop.f32.mrb[23].mxu0 }
 0x277   : > { %v5309_v15 = vpack.c.bf16 %v3998_v13, %v816_v14 }
 0x285   : > { %v4001_v16 = vpop.f32.mrb[24].mxu0 }
 0x286   : > { %v826_v17 = vpop.f32.mrb[25].mxu0 }
 0x287   : > { %v5311_v18 = vpack.c.bf16 %v4001_v16, %v826_v17 }
 0x28d   : > { %v4004_v19 = vpop.f32.mrb[26].mxu0 }
 0x28e   : > { %v836_v20 = vpop.f32.mrb[27].mxu0 }
 0x28f   : > { %v5313_v21 = vpack.c.bf16 %v4004_v19, %v836_v20 }
 0x304   : > { %v4125_v22 = vpop.f32.mrb[42].mxu1 }
 0x305   : > { %v1450_v23 = vpop.f32.mrb[43].mxu1  ;;  %v1463_v25 = vsel %vm1459_vm1, %v4125_v22, -inf }
 0x306   : > { %v1460_v24 = vsel %vm1459_vm1, %v1450_v23, -inf }
 0x307   : > { %1461 = vmax.xlane.f32.xlu1 %v1460_v24 }
 0x30b   : > { %1464 = vmax.xlane.f32.xlu1 %v1463_v25 }
 0x394   : > { %v1462_v55 = vpop.xlane.xlu1 %1461 }
 0x395   : > { %v1466_v56 = vsub.f32 %v1450_v23, %v1462_v55 }
 0x397   : > { %v1468_v57 = vmul.f32 1.442695, %v1466_v56 }
 0x398   : > { %v1465_v59 = vpop.xlane.xlu1 %1464 }
 0x399   : > { %4555 = vpow2.f32 %v1468_v57  ;;  %v1467_v61 = vsub.f32 %v4125_v22, %v1465_v59  ;;  %v4007_v22 = vpop.f32.mrb[28].mxu0 }
 0x39a   : > { %v846_v23 = vpop.f32.mrb[29].mxu0 }
 0x39b   : > { %v1470_v62 = vmul.f32 1.442695, %v1467_v61  ;;  %v5315_v24 = vpack.c.bf16 %v4007_v22, %v846_v23  ;;  %v4010_v25 = vpop.f32.mrb[30].mxu0 }
 0x39c   : > { %v856_v30 = vpop.f32.mrb[31].mxu0 }
 0x39d   : > { %4557 = vpow2.f32 %v1470_v62  ;;  %v5317_v31 = vpack.c.bf16 %v4010_v25, %v856_v30  ;;  %v4013_v33 = vpop.f32.mrb[32].mxu0 }
 0x39e   : > { %v866_v34 = vpop.f32.mrb[33].mxu0 }
 0x39f   : > { %4130 = vmatprep.mubr.msk.f32.mxu1 %vm1459_vm1, %v866_v34  ;;  %v4016_v36 = vpop.f32.mrb[34].mxu0 }
 0x3a0   : > { %v876_v37 = vpop.f32.mrb[35].mxu0 }
 0x3a1   : > { %v4019_v25 = vpop.f32.mrb[36].mxu0 }
 0x3a2   : > { %v886_v30 = vpop.f32.mrb[37].mxu0 }
 0x3a3   : > { %v4556_v0 = vpop.eup %4555 }
 0x3a4   : > { %v1472_v2 = vsel %vm1459_vm1, %v4556_v0, 0.0 }
 0x3a5   : > { %1473 = vadd.xlane.f32.xlu1 %v1472_v2 }
 0x3a7   : > { %v4558_v3 = vpop.eup %4557 }
 0x3a8   : > { %v1475_v10 = vsel %vm1459_vm1, %v4558_v3, 0.0 }
 0x3a9   : > { %1476 = vadd.xlane.f32.xlu1 %v1475_v10 }
 0x432   : > { %v1474_v39 = vpop.xlane.xlu1 %1473 }
 0x433   : > { %4559 = vrcp.f32 %v1474_v39 }
 0x436   : > { %v1477_v40 = vpop.xlane.xlu1 %1476 }
 0x437   : > { %4561 = vrcp.f32 %v1477_v40 }
 0x43d   : > { %v4560_v42 = vpop.eup %4559 }
 0x43e   : > { %v1480_v45 = vmul.f32 %v4560_v42, %v4556_v0 }
 0x441   : > { %v4562_v43 = vpop.eup %4561 }
 0x442   : > { %v1481_v46 = vmul.f32 %v4562_v43, %v4558_v3 }
 0x444   : > { %v4307_v49 = vpack.c.bf16 %v1481_v46, %v1480_v45  ;;  %v1839_v46 = vpop.trf.xlu0 }
 0x446   : > { %4309 = vmatprep.subr.msk.bf16.mxu1 %vm5322_vm2, %v4307_v49 }
 0x447   : > { %4312 = vmatpush3.bf16.xpose.msk.msra.mxu1 %vm5322_vm2, %v4307_v49 }
 0x448   : > { %4314 = vmatprep.subr.bf16.mxu1 %v5292_v32  ;;  %v1840_v49 = vpop.trf.xlu0 }
 0x44e   : > { %4131 = vmatmul.mubr.msk.f32.vlgmr.msra.gmra.mrb[44].mxu1 %vm1459_vm1, %v4013_v33 }
 0x44f   : > { %4316 = vmatpush3.bf16.msra.mxu1 %v5292_v32  ;;  %4133 = vmatprep.mubr.msk.f32.mxu1 %vm1459_vm1, %v876_v37  ;;  %v414_v32 = vld [vmem:[#allocation7 + $0x238] sm:$0xff] }
 0x450   : > { %4318 = vmatprep.subr.bf16.mxu1 %v5294_v35  ;;  %4021 = vmatmul.mubr.msk.f32.gmra.mrb[38].mxu0 %vm447_vm0, %v414_v32 }
 0x452   : > { %4134 = vmatmul.mubr.msk.f32.gmra.mrb[46].mxu1 %vm1459_vm1, %v4016_v36 }
 0x453   : > { %4320 = vmatpush3.bf16.msra.mxu1 %v5294_v35  ;;  %4144 = vmatprep.mubr.msk.f32.mxu1 %vm447_vm0, %v1601_v50  ;;  %v415_v50 = vld [vmem:[#allocation7 + $0x240] sm:$0xff] }
 0x454   : > { %4023 = vmatprep.mubr.msk.f32.mxu0 %vm447_vm0, %v415_v50  ;;  %v426_v50 = vld [vmem:[#allocation7 + $0x298] sm:$0xff] }
 0x456   : > { %4145 = vmatmul.mubr.msk.f32.vlgmr.msra.gmra.mrb[48].mxu1 %vm447_vm0, %v1602_v51  ;;  %v416_v51 = vld [vmem:[#allocation7 + $0x248] sm:$0xff] }
 0x457   : > { %4151 = vmatprep.mubr.msk.f32.mxu1 %vm1459_vm1, %v886_v30  ;;  %4024 = vmatmul.mubr.msk.f32.gmra.mrb[40].mxu0 %vm447_vm0, %v416_v51  ;;  %v427_v51 = vld [vmem:[#allocation7 + $0x2a0] sm:$0xff] }
 0x458   : > { %4026 = vmatprep.mubr.msk.f32.mxu0 %vm447_vm0, %v417_v52  ;;  %v428_v52 = vld [vmem:[#allocation7 + $0x2a8] sm:$0xff] }
 0x521   : > { %v5343_v55 = vpop.f32.mrb[44].mxu1 }
 0x522   : > { %v5345_v35 = vpop.f32.mrb[45].mxu1 }
 0x523   : > { %v4413_v56 = vpack.c.bf16 %v5343_v55, %v5345_v35  ;;  %v4022_v33 = vpop.f32.mrb[38].mxu0 }
 0x524   : > { %v896_v34 = vpop.f32.mrb[39].mxu0 }
 0x525   : > { %v5349_v57 = vpop.f32.mrb[46].mxu1 }
 0x526   : > { %v5351_v59 = vpop.f32.mrb[47].mxu1 }
 0x527   : > { %v4417_v61 = vpack.c.bf16 %v5349_v57, %v5351_v59 }
 0x529   : > { %v4146_v62 = vpop.f32.mrb[48].mxu1 }
 0x52a   : > { %v1689_v0 = vpop.f32.mrb[49].mxu1  ;;  %v1701_v3 = vsel %vm1459_vm1, %v4146_v62, -inf }
 0x52b   : > { %v1698_v2 = vsel %vm1459_vm1, %v1689_v0, -inf }
 0x52c   : > { %1699 = vmax.xlane.f32.xlu1 %v1698_v2 }
 0x530   : > { %1702 = vmax.xlane.f32.xlu1 %v1701_v3 }
 0x5b9   : > { %v1700_v10 = vpop.xlane.xlu1 %1699 }
 0x5ba   : > { %v1704_v11 = vsub.f32 %v1689_v0, %v1700_v10 }
 0x5bc   : > { %v1706_v13 = vmul.f32 1.442695, %v1704_v11 }
 0x5bd   : > { %v1703_v14 = vpop.xlane.xlu1 %1702 }
 0x5be   : > { %4563 = vpow2.f32 %v1706_v13  ;;  %v1705_v16 = vsub.f32 %v4146_v62, %v1703_v14 }
 0x5c0   : > { %v1708_v17 = vmul.f32 1.442695, %v1705_v16 }
 0x5c2   : > { %4565 = vpow2.f32 %v1708_v17 }
 0x5c8   : > { %v4564_v19 = vpop.eup %4563 }
 0x5c9   : > { %v1710_v20 = vsel %vm1459_vm1, %v4564_v19, 0.0 }
 0x5ca   : > { %1711 = vadd.xlane.f32.xlu1 %v1710_v20 }
 0x5cc   : > { %v4566_v22 = vpop.eup %4565 }
 0x5cd   : > { %v1713_v23 = vsel %vm1459_vm1, %v4566_v22, 0.0 }
 0x5ce   : > { %1714 = vadd.xlane.f32.xlu1 %v1713_v23 }
 0x657   : > { %v1712_v36 = vpop.xlane.xlu1 %1711 }
 0x658   : > { %4567 = vrcp.f32 %v1712_v36  ;;  %v420_v36 = vld [vmem:[#allocation7 + $0x268] sm:$0xff] }
 0x65b   : > { %v1715_v37 = vpop.xlane.xlu1 %1714 }
 0x65c   : > { %4569 = vrcp.f32 %v1715_v37 }
 0x662   : > { %v4568_v39 = vpop.eup %4567 }
 0x663   : > { %v1718_v42 = vmul.f32 %v4568_v39, %v4564_v19 }
 0x666   : > { %v4570_v40 = vpop.eup %4569 }
 0x667   : > { %v1719_v43 = vmul.f32 %v4570_v40, %v4566_v22  ;;  %v421_v40 = vld [vmem:[#allocation7 + $0x270] sm:$0xff] }
 0x669   : > { %v4321_v45 = vpack.c.bf16 %v1719_v43, %v1718_v42  ;;  %v422_v43 = vld [vmem:[#allocation7 + $0x278] sm:$0xff] }
 0x66b   : > { %4323 = vmatprep.subr.msk.bf16.mxu1 %vm5322_vm2, %v4321_v45 }
 0x66c   : > { %4326 = vmatpush3.bf16.xpose.msk.msra.mxu1 %vm5322_vm2, %v4321_v45  ;;  %v423_v45 = vld [vmem:[#allocation7 + $0x280] sm:$0xff] }
 0x66d   : > { %4328 = vmatprep.subr.bf16.mxu1 %v5296_v38 }
 0x673   : > { %4152 = vmatmul.mubr.msk.f32.vlgmr.msra.gmra.mrb[50].mxu1 %vm1459_vm1, %v4019_v25 }
 0x674   : > { %4330 = vmatpush3.bf16.msra.mxu1 %v5296_v38  ;;  %4154 = vmatprep.mubr.msk.f32.mxu1 %vm1459_vm1, %v896_v34  ;;  %v418_v38 = vld [vmem:[#allocation7 + $0x258] sm:$0xff]  ;;  %v419_v34 = vld [vmem:[#allocation7 + $0x260] sm:$0xff] }
 0x675   : > { %4332 = vmatprep.subr.bf16.mxu1 %v5298_v41  ;;  %4027 = vmatmul.mubr.msk.f32.gmra.mrb[42].mxu0 %vm447_vm0, %v418_v38 }
 0x676   : > { %4029 = vmatprep.mubr.msk.f32.mxu0 %vm447_vm0, %v419_v34 }
 0x677   : > { %4155 = vmatmul.mubr.msk.f32.gmra.mrb[52].mxu1 %vm1459_vm1, %v4022_v33  ;;  %v4025_v33 = vpop.f32.mrb[40].mxu0 }
 0x678   : > { %4334 = vmatpush3.bf16.msra.mxu1 %v5298_v41  ;;  %4165 = vmatprep.mubr.msk.f32.mxu1 %vm447_vm0, %v1839_v46  ;;  %v906_v37 = vpop.f32.mrb[41].mxu0  ;;  %v424_v46 = vld [vmem:[#allocation7 + $0x288] sm:$0xff] }
 0x679   : > { %4030 = vmatmul.mubr.msk.f32.gmra.mrb[44].mxu0 %vm447_vm0, %v420_v36 }
 0x67a   : > { %4032 = vmatprep.mubr.msk.f32.mxu0 %vm447_vm0, %v421_v40 }
 0x67b   : > { %4166 = vmatmul.mubr.msk.f32.vlgmr.msra.gmra.mrb[54].mxu1 %vm447_vm0, %v1840_v49  ;;  %v425_v49 = vld [vmem:[#allocation7 + $0x290] sm:$0xff] }
 0x67c   : > { %4172 = vmatprep.mubr.msk.f32.mxu1 %vm1459_vm1, %v906_v37 }
 0x67d   : > { %4033 = vmatmul.mubr.msk.f32.gmra.mrb[46].mxu0 %vm447_vm0, %v422_v43 }
 0x67e   : > { %4035 = vmatprep.mubr.msk.f32.mxu0 %vm447_vm0, %v423_v45 }
 0x681   : > { %4036 = vmatmul.mubr.msk.f32.gmra.mrb[48].mxu0 %vm447_vm0, %v424_v46 }
 0x682   : > { %4038 = vmatprep.mubr.msk.f32.mxu0 %vm447_vm0, %v425_v49 }
 0x685   : > { %4039 = vmatmul.mubr.msk.f32.gmra.mrb[50].mxu0 %vm447_vm0, %v426_v50 }
 0x686   : > { %4041 = vmatprep.mubr.msk.f32.mxu0 %vm447_vm0, %v427_v51 }
 0x689   : > { %4042 = vmatmul.mubr.msk.f32.gmra.mrb[52].mxu0 %vm447_vm0, %v428_v52 }
 0x746   : > { %v5377_v53 = vpop.f32.mrb[50].mxu1 }
 0x747   : > { %v5379_v41 = vpop.f32.mrb[51].mxu1 }
 0x748   : > { %v4421_v54 = vpack.c.bf16 %v5377_v53, %v5379_v41  ;;  %v4028_v39 = vpop.f32.mrb[42].mxu0 }
 0x749   : > { %v916_v42 = vpop.f32.mrb[43].mxu0 }
 0x74a   : > { %v5383_v32 = vpop.f32.mrb[52].mxu1 }
 0x74b   : > { %v5385_v62 = vpop.f32.mrb[53].mxu1 }
 0x74c   : > { %v4425_v0 = vpack.c.bf16 %v5383_v32, %v5385_v62 }
 0x74e   : > { %v4167_v2 = vpop.f32.mrb[54].mxu1 }
 0x74f   : > { %v1927_v3 = vpop.f32.mrb[55].mxu1  ;;  %v1939_v11 = vsel %vm1459_vm1, %v4167_v2, -inf }
 0x750   : > { %v1936_v10 = vsel %vm1459_vm1, %v1927_v3, -inf }
 0x751   : > { %1937 = vmax.xlane.f32.xlu1 %v1936_v10 }
 0x755   : > { %1940 = vmax.xlane.f32.xlu1 %v1939_v11 }
 0x7de   : > { %v1938_v13 = vpop.xlane.xlu1 %1937 }
 0x7df   : > { %v1942_v14 = vsub.f32 %v1927_v3, %v1938_v13 }
 0x7e1   : > { %v1944_v16 = vmul.f32 1.442695, %v1942_v14 }
 0x7e2   : > { %v1941_v17 = vpop.xlane.xlu1 %1940 }
 0x7e3   : > { %4571 = vpow2.f32 %v1944_v16  ;;  %v1943_v19 = vsub.f32 %v4167_v2, %v1941_v17 }
 0x7e5   : > { %v1946_v20 = vmul.f32 1.442695, %v1943_v19 }
 0x7e7   : > { %4573 = vpow2.f32 %v1946_v20 }
 0x7ed   : > { %v4572_v22 = vpop.eup %4571 }
 0x7ee   : > { %v1948_v23 = vsel %vm1459_vm1, %v4572_v22, 0.0 }
 0x7ef   : > { %1949 = vadd.xlane.f32.xlu1 %v1948_v23 }
 0x7f1   : > { %v4574_v25 = vpop.eup %4573 }
 0x7f2   : > { %v1951_v30 = vsel %vm1459_vm1, %v4574_v25, 0.0 }
 0x7f3   : > { %1952 = vadd.xlane.f32.xlu1 %v1951_v30 }
 0x826   : > { %2299 = vxpose.xlu1.b32.start [1/4] (short) (narrow) %v5250_v27, 16 }
 0x82a   : > { %2300 = vxpose.xlu1.b32.cont [2/4] (short) (narrow) %v5248_v26, 16  ;;  %v2077_v26 = vpop.trf.xlu0 }
 0x82e   : > { %2301 = vxpose.xlu1.b32.cont [3/4] (short) (narrow) %v5254_v29, 16  ;;  %v2078_v27 = vpop.trf.xlu0 }
 0x832   : > { %2302 = vxpose.xlu1.b32.end [4/4] (short) (narrow) %v5252_v28, 16  ;;  %v2553_v28 = vpop.trf.xlu0 }
 0x836   : > { %v2554_v16 = vpop.trf.xlu0 }
 0x87c   : > { %v1950_v38 = vpop.xlane.xlu1 %1949 }
 0x87d   : > { %4575 = vrcp.f32 %v1950_v38 }
 0x880   : > { %v1953_v2 = vpop.xlane.xlu1 %1952 }
 0x881   : > { %4577 = vrcp.f32 %v1953_v2 }
 0x887   : > { %v4576_v3 = vpop.eup %4575 }
 0x888   : > { %v1956_v11 = vmul.f32 %v4576_v3, %v4572_v22 }
 0x88b   : > { %v4578_v10 = vpop.eup %4577 }
 0x88c   : > { %v1957_v13 = vmul.f32 %v4578_v10, %v4574_v25 }
 0x88e   : > { %v4335_v14 = vpack.c.bf16 %v1957_v13, %v1956_v11 }
 0x890   : > { %4337 = vmatprep.subr.msk.bf16.mxu1 %vm5322_vm2, %v4335_v14 }
 0x891   : > { %4340 = vmatpush3.bf16.xpose.msk.msra.mxu1 %vm5322_vm2, %v4335_v14 }
 0x892   : > { %4342 = vmatprep.subr.bf16.mxu1 %v5300_v44 }
 0x898   : > { %4173 = vmatmul.mubr.msk.f32.vlgmr.msra.gmra.mrb[56].mxu1 %vm1459_vm1, %v4025_v33 }
 0x899   : > { %4344 = vmatpush3.bf16.msra.mxu1 %v5300_v44  ;;  %4175 = vmatprep.mubr.msk.f32.mxu1 %vm1459_vm1, %v916_v42  ;;  %v2791_v44 = vpop.trf.xlu0 }
 0x89a   : > { %4346 = vmatprep.subr.bf16.mxu1 %v5302_v47 }
 0x89c   : > { %4176 = vmatmul.mubr.msk.f32.gmra.mrb[58].mxu1 %vm1459_vm1, %v4028_v39 }
 0x89d   : > { %4348 = vmatpush3.bf16.msra.mxu1 %v5302_v47  ;;  %4186 = vmatprep.mubr.msk.f32.mxu1 %vm447_vm0, %v2077_v26  ;;  %v2792_v47 = vpop.trf.xlu0 }
 0x8a0   : > { %4187 = vmatmul.mubr.msk.f32.vlgmr.msra.gmra.mrb[60].mxu1 %vm447_vm0, %v2078_v27 }
 0x8a6   : > { %v2315_v29 = vpop.trf.xlu1 }
 0x8a7   : > { %4207 = vmatprep.mubr.msk.f32.mxu0 %vm447_vm0, %v2315_v29 }
 0x8aa   : > { %v2316_v17 = vpop.trf.xlu1 }
 0x8ab   : > { %4208 = vmatmul.mubr.msk.f32.vlgmr.msra.gmra.mrb[54].mxu0 %vm447_vm0, %v2316_v17 }
 0x8ac   : > { %4372 = vmatpush3.bf16.msra.mxu0 %v5306_v12  ;;  %4228 = vmatprep.mubr.msk.f32.mxu0 %vm447_vm0, %v2553_v28  ;;  %v3029_v12 = vpop.trf.xlu0 }
 0x8ad   : > { %4374 = vmatprep.subr.bf16.mxu0 %v5309_v15 }
 0x8b0   : > { %4376 = vmatpush3.bf16.msra.mxu0 %v5309_v15  ;;  %v3030_v15 = vpop.trf.xlu0 }
 0x8b1   : > { %4384 = vmatprep.subr.bf16.mxu0 %v5311_v18 }
 0x8b3   : > { %4229 = vmatmul.mubr.msk.f32.vlgmr.msra.gmra.mrb[56].mxu0 %vm447_vm0, %v2554_v16 }
 0x8b4   : > { %4386 = vmatpush3.bf16.msra.mxu0 %v5311_v18  ;;  %4249 = vmatprep.mubr.msk.f32.mxu0 %vm447_vm0, %v2791_v44  ;;  %v5440_v18 = vpop.f32.mrb[44].mxu0 }
 0x8b5   : > { %4388 = vmatprep.subr.bf16.mxu0 %v5313_v21  ;;  %v926_v19 = vpop.f32.mrb[45].mxu0 }
 0x8b6   : > { %4193 = vmatprep.mubr.msk.f32.mxu1 %vm1459_vm1, %v926_v19 }
 0x8b8   : > { %4390 = vmatpush3.bf16.msra.mxu0 %v5313_v21  ;;  %v5443_v21 = vpop.f32.mrb[46].mxu0 }
 0x8b9   : > { %4398 = vmatprep.subr.bf16.mxu0 %v5315_v24  ;;  %v5445_v20 = vpop.f32.mrb[47].mxu0 }
 0x8ba   : > { %v5447_v22 = vpop.f32.mrb[48].mxu0 }
 0x8bb   : > { %4250 = vmatmul.mubr.msk.f32.vlgmr.msra.gmra.mrb[58].mxu0 %vm447_vm0, %v2792_v47 }
 0x8bc   : > { %4400 = vmatpush3.bf16.msra.mxu0 %v5315_v24  ;;  %4270 = vmatprep.mubr.msk.f32.mxu0 %vm447_vm0, %v3029_v12  ;;  %v5449_v24 = vpop.f32.mrb[49].mxu0 }
 0x8bd   : > { %4402 = vmatprep.subr.bf16.mxu0 %v5317_v31  ;;  %v5451_v23 = vpop.f32.mrb[50].mxu0 }
 0x8be   : > { %v5453_v25 = vpop.f32.mrb[51].mxu0 }
 0x8c0   : > { %4404 = vmatpush3.bf16.msra.mxu0 %v5317_v31  ;;  %v5455_v31 = vpop.f32.mrb[52].mxu0 }
 0x8c1   : > { %v5457_v30 = vpop.f32.mrb[53].mxu0 }
 0x8c3   : > { %4271 = vmatmul.mubr.msk.f32.vlgmr.msra.gmra.mrb[60].mxu0 %vm447_vm0, %v3030_v15 }
 0x96b   : > { %v5459_v33 = vpop.f32.mrb[56].mxu1 }
 0x96c   : > { %v5461_v34 = vpop.f32.mrb[57].mxu1 }
 0x96d   : > { %v4429_v36 = vpack.c.bf16 %v5459_v33, %v5461_v34  ;;  %v3253_v33 = vld [vmem:[#allocation8 + $0x10] sm:$0xff]  ;;  %v3256_v34 = vld [vmem:[#allocation8 + $0x28] sm:$0xff] }
 0x96f   : > { %v5465_v37 = vpop.f32.mrb[58].mxu1 }
 0x970   : > { %v5467_v39 = vpop.f32.mrb[59].mxu1 }
 0x971   : > { %v4433_v40 = vpack.c.bf16 %v5465_v37, %v5467_v39  ;;  %v3258_v37 = vld [vmem:[#allocation8 + $0x38] sm:$0xff]  ;;  %v3257_v39 = vld [vmem:[#allocation8 + $0x30] sm:$0xff] }
 0x973   : > { %v4188_v42 = vpop.f32.mrb[60].mxu1 }
 0x974   : > { %v2165_v43 = vpop.f32.mrb[61].mxu1  ;;  %v2177_v45 = vsel %vm1459_vm1, %v4188_v42, -inf }
 0x975   : > { %2178 = vmax.xlane.f32.xlu0 %v2177_v45  ;;  %v2174_v46 = vsel %vm1459_vm1, %v2165_v43, -inf }
 0x976   : > { %2175 = vmax.xlane.f32.xlu1 %v2174_v46 }
 0x97e   : > { %v4209_v49 = vpop.f32.mrb[54].mxu0 }
 0x97f   : > { %v2403_v50 = vpop.f32.mrb[55].mxu0  ;;  %v2415_v52 = vsel %vm1459_vm1, %v4209_v49, -inf }
 0x980   : > { %v2412_v51 = vsel %vm1459_vm1, %v2403_v50, -inf }
 0x981   : > { %2413 = vmax.xlane.f32.xlu1 %v2412_v51 }
 0x985   : > { %2416 = vmax.xlane.f32.xlu1 %v2415_v52 }
 0x986   : > { %v4230_v38 = vpop.f32.mrb[56].mxu0 }
 0x987   : > { %v2641_v2 = vpop.f32.mrb[57].mxu0  ;;  %v2653_v3 = vsel %vm1459_vm1, %v4230_v38, -inf }
 0x988   : > { %v2650_v10 = vsel %vm1459_vm1, %v2641_v2, -inf }
 0x989   : > { %2651 = vmax.xlane.f32.xlu0 %v2650_v10  ;;  %2654 = vmax.xlane.f32.xlu1 %v2653_v3 }
 0x98e   : > { %v4251_v11 = vpop.f32.mrb[58].mxu0 }
 0x98f   : > { %v2879_v13 = vpop.f32.mrb[59].mxu0  ;;  %v2891_v14 = vsel %vm1459_vm1, %v4251_v11, -inf }
 0x990   : > { %2892 = vmax.xlane.f32.xlu1 %v2891_v14  ;;  %v2888_v26 = vsel %vm1459_vm1, %v2879_v13, -inf }
 0x991   : > { %2889 = vmax.xlane.f32.xlu0 %v2888_v26 }
 0x996   : > { %v4272_v27 = vpop.f32.mrb[60].mxu0 }
 0x997   : > { %v3117_v28 = vpop.f32.mrb[61].mxu0  ;;  %v3129_v29 = vsel %vm1459_vm1, %v4272_v27, -inf }
 0x998   : > { %3130 = vmax.xlane.f32.xlu1 %v3129_v29  ;;  %v3126_v16 = vsel %vm1459_vm1, %v3117_v28, -inf }
 0x999   : > { %3127 = vmax.xlane.f32.xlu0 %v3126_v16 }
 0xa02   : > { %v2179_v17 = vpop.xlane.xlu0 %2178 }
 0xa03   : > { %v2181_v44 = vsub.f32 %v4188_v42, %v2179_v17  ;;  %v2176_v47 = vpop.xlane.xlu1 %2175 }
 0xa04   : > { %v2180_v12 = vsub.f32 %v2165_v43, %v2176_v47 }
 0xa05   : > { %v2184_v15 = vmul.f32 1.442695, %v2181_v44 }
 0xa06   : > { %v2182_v19 = vmul.f32 1.442695, %v2180_v12 }
 0xa07   : > { %4579 = vpow2.f32 %v2184_v15 }
 0xa08   : > { %4581 = vpow2.f32 %v2182_v19 }
 0xa0e   : > { %v2414_v45 = vpop.xlane.xlu1 %2413 }
 0xa0f   : > { %v2418_v46 = vsub.f32 %v2403_v50, %v2414_v45 }
 0xa11   : > { %v5481_v51 = vpop.eup %4579  ;;  %v2420_v52 = vmul.f32 1.442695, %v2418_v46 }
 0xa12   : > { %v5483_v3 = vpop.eup %4581  ;;  %v2417_v10 = vpop.xlane.xlu1 %2416  ;;  %v2189_v14 = vsel %vm1459_vm1, %v5481_v51, 0.0 }
 0xa13   : > { %4583 = vpow2.f32 %v2420_v52  ;;  %v2419_v26 = vsub.f32 %v4209_v49, %v2417_v10  ;;  %2190 = vadd.xlane.f32.xlu1 %v2189_v14  ;;  %v2186_v42 = vsel %vm1459_vm1, %v5483_v3, 0.0 }
 0xa14   : > { %2187 = vadd.xlane.f32.xlu0 %v2186_v42 }
 0xa15   : > { %v2422_v43 = vmul.f32 1.442695, %v2419_v26 }
 0xa16   : > { %v2652_v29 = vpop.xlane.xlu0 %2651  ;;  %v2655_v16 = vpop.xlane.xlu1 %2654 }
 0xa17   : > { %4585 = vpow2.f32 %v2422_v43  ;;  %v2656_v50 = vsub.f32 %v2641_v2, %v2652_v29  ;;  %v2657_v17 = vsub.f32 %v4230_v38, %v2655_v16 }
 0xa19   : > { %v2658_v44 = vmul.f32 1.442695, %v2656_v50  ;;  %v2660_v47 = vmul.f32 1.442695, %v2657_v17 }
 0xa1b   : > { %4587 = vpow2.f32 %v2658_v44 }
 0xa1c   : > { %4589 = vpow2.f32 %v2660_v47 }
 0xa1d   : > { %v5489_v12 = vpop.eup %4583  ;;  %v2893_v15 = vpop.xlane.xlu1 %2892 }
 0xa1e   : > { %v2895_v19 = vsub.f32 %v4251_v11, %v2893_v15  ;;  %v2890_v49 = vpop.xlane.xlu0 %2889  ;;  %v2424_v45 = vsel %vm1459_vm1, %v5489_v12, 0.0 }
 0xa1f   : > { %v2894_v46 = vsub.f32 %v2879_v13, %v2890_v49  ;;  %2425 = vadd.xlane.f32.xlu0 %v2424_v45 }
 0xa20   : > { %v2898_v52 = vmul.f32 1.442695, %v2895_v19 }
 0xa21   : > { %v4586_v10 = vpop.eup %4585  ;;  %v2896_v14 = vmul.f32 1.442695, %v2894_v46 }
 0xa22   : > { %4591 = vpow2.f32 %v2898_v52  ;;  %v2427_v38 = vsel %vm1459_vm1, %v4586_v10, 0.0 }
 0xa23   : > { %4593 = vpow2.f32 %v2896_v14  ;;  %2428 = vadd.xlane.f32.xlu1 %v2427_v38 }
 0xa25   : > { %v4588_v2 = vpop.eup %4587  ;;  %v3131_v26 = vpop.xlane.xlu1 %3130 }
 0xa26   : > { %v4590_v42 = vpop.eup %4589  ;;  %v3133_v43 = vsub.f32 %v4272_v27, %v3131_v26  ;;  %v3128_v29 = vpop.xlane.xlu0 %3127  ;;  %v2662_v11 = vsel %vm1459_vm1, %v4588_v2, 0.0 }
 0xa27   : > { %v3132_v16 = vsub.f32 %v3117_v28, %v3128_v29  ;;  %2663 = vadd.xlane.f32.xlu0 %v2662_v11  ;;  %v2665_v13 = vsel %vm1459_vm1, %v4590_v42, 0.0 }
 0xa28   : > { %v3136_v50 = vmul.f32 1.442695, %v3133_v43  ;;  %2666 = vadd.xlane.f32.xlu1 %v2665_v13 }
 0xa29   : > { %v3134_v17 = vmul.f32 1.442695, %v3132_v16 }
 0xa2a   : > { %4595 = vpow2.f32 %v3136_v50 }
 0xa2b   : > { %4597 = vpow2.f32 %v3134_v17 }
 0xa2c   : > { %v4592_v44 = vpop.eup %4591 }
 0xa2d   : > { %v4594_v47 = vpop.eup %4593  ;;  %v2903_v15 = vsel %vm1459_vm1, %v4592_v44, 0.0 }
 0xa2e   : > { %2904 = vadd.xlane.f32.xlu1 %v2903_v15  ;;  %v2900_v19 = vsel %vm1459_vm1, %v4594_v47, 0.0 }
 0xa2f   : > { %2901 = vadd.xlane.f32.xlu0 %v2900_v19 }
 0xa34   : > { %v5498_v27 = vpop.eup %4595 }
 0xa35   : > { %v5500_v49 = vpop.eup %4597  ;;  %v3141_v28 = vsel %vm1459_vm1, %v5498_v27, 0.0 }
 0xa36   : > { %3142 = vadd.xlane.f32.xlu1 %v3141_v28  ;;  %v3138_v45 = vsel %vm1459_vm1, %v5500_v49, 0.0 }
 0xa37   : > { %3139 = vadd.xlane.f32.xlu0 %v3138_v45 }
 0xaa0   : > { %v2191_v46 = vpop.xlane.xlu1 %2190 }
 0xaa1   : > { %4599 = vrcp.f32 %v2191_v46  ;;  %v2188_v52 = vpop.xlane.xlu0 %2187 }
 0xaa2   : > { %4601 = vrcp.f32 %v2188_v52 }
 0xaab   : > { %v4600_v14 = vpop.eup %4599 }
 0xaac   : > { %v4602_v38 = vpop.eup %4601  ;;  %v2426_v26 = vpop.xlane.xlu0 %2425  ;;  %v2195_v43 = vmul.f32 %v4600_v14, %v5481_v51 }
 0xaad   : > { %v2194_v29 = vmul.f32 %v4602_v38, %v5483_v3  ;;  %4603 = vrcp.f32 %v2426_v26 }
 0xaaf   : > { %v4349_v11 = vpack.c.bf16 %v2195_v43, %v2194_v29 }
 0xab0   : > { %v2429_v16 = vpop.xlane.xlu1 %2428 }
 0xab1   : > { %4605 = vrcp.f32 %v2429_v16  ;;  %4351 = vmatprep.subr.msk.bf16.mxu1 %vm5322_vm2, %v4349_v11 }
 0xab2   : > { %4354 = vmatpush3.bf16.xpose.msk.msra.mxu1 %vm5322_vm2, %v4349_v11 }
 0xab4   : > { %v2664_v13 = vpop.xlane.xlu0 %2663 }
 0xab5   : > { %4607 = vrcp.f32 %v2664_v13  ;;  %v2667_v50 = vpop.xlane.xlu1 %2666 }
 0xab6   : > { %4609 = vrcp.f32 %v2667_v50 }
 0xab7   : > { %v4604_v17 = vpop.eup %4603 }
 0xab8   : > { %v2432_v19 = vmul.f32 %v4604_v17, %v5489_v12 }
 0xab9   : > { %4194 = vmatmul.mubr.msk.f32.vlgmr.msra.gmra.mrb[62].mxu1 %vm1459_vm1, %v5440_v18 }
 0xaba   : > { %4196 = vmatprep.mubr.msk.f32.mxu1 %vm1459_vm1, %v5445_v20 }
 0xabb   : > { %v4606_v51 = vpop.eup %4605  ;;  %v2905_v3 = vpop.xlane.xlu1 %2904 }
 0xabc   : > { %4611 = vrcp.f32 %v2905_v3  ;;  %v2902_v15 = vpop.xlane.xlu0 %2901  ;;  %v2433_v28 = vmul.f32 %v4606_v51, %v4586_v10 }
 0xabd   : > { %4613 = vrcp.f32 %v2902_v15  ;;  %4197 = vmatmul.mubr.msk.f32.gmra.mrb[64].mxu1 %vm1459_vm1, %v5443_v21  ;;  %v3254_v15 = vld [vmem:[#allocation8 + $0x18] sm:$0xff] }
 0xabe   : > { %4214 = vmatprep.mubr.msk.f32.mxu1 %vm1459_vm1, %v5449_v24  ;;  %v4363_v45 = vpack.c.bf16 %v2433_v28, %v2432_v19 }
 0xabf   : > { %v4608_v46 = vpop.eup %4607 }
 0xac0   : > { %v4610_v18 = vpop.eup %4609  ;;  %4365 = vmatprep.subr.msk.bf16.mxu1 %vm5322_vm2, %v4363_v45  ;;  %v2670_v20 = vmul.f32 %v4608_v46, %v4588_v2 }
 0xac1   : > { %4368 = vmatpush3.bf16.xpose.msk.msra.mxu1 %vm5322_vm2, %v4363_v45  ;;  %v2671_v52 = vmul.f32 %v4610_v18, %v4590_v42 }
 0xac3   : > { %v3143_v12 = vpop.xlane.xlu1 %3142  ;;  %v4377_v10 = vpack.c.bf16 %v2671_v52, %v2670_v20 }
 0xac4   : > { %4615 = vrcp.f32 %v3143_v12  ;;  %v3140_v14 = vpop.xlane.xlu0 %3139 }
 0xac5   : > { %4617 = vrcp.f32 %v3140_v14  ;;  %4379 = vmatprep.subr.msk.bf16.mxu1 %vm5322_vm2, %v4377_v10 }
 0xac6   : > { %v4612_v21 = vpop.eup %4611 }
 0xac7   : > { %v4614_v24 = vpop.eup %4613  ;;  %v2909_v38 = vmul.f32 %v4612_v21, %v4592_v44 }
 0xac8   : > { %4215 = vmatmul.mubr.msk.f32.vlgmr.msra.gmra.mrb[66].mxu1 %vm1459_vm1, %v5447_v22  ;;  %v2908_v26 = vmul.f32 %v4614_v24, %v4594_v47 }
 0xac9   : > { %4217 = vmatprep.mubr.msk.f32.mxu1 %vm1459_vm1, %v5453_v25  ;;  %4382 = vmatpush3.bf16.xpose.msk.msra.mxu1 %vm5322_vm2, %v4377_v10 }
 0xaca   : > { %v4391_v2 = vpack.c.bf16 %v2909_v38, %v2908_v26 }
 0xacc   : > { %4393 = vmatprep.subr.msk.bf16.mxu1 %vm5322_vm2, %v4391_v2  ;;  %4218 = vmatmul.mubr.msk.f32.gmra.mrb[68].mxu1 %vm1459_vm1, %v5451_v23 }
 0xacd   : > { %4235 = vmatprep.mubr.msk.f32.mxu1 %vm1459_vm1, %v5457_v30 }
 0xace   : > { %v4616_v42 = vpop.eup %4615 }
 0xacf   : > { %v4618_v44 = vpop.eup %4617  ;;  %v3147_v22 = vmul.f32 %v4616_v42, %v5498_v27 }
 0xad0   : > { %4236 = vmatmul.mubr.msk.f32.vlgmr.msra.gmra.mrb[70].mxu1 %vm1459_vm1, %v5455_v31  ;;  %v3146_v25 = vmul.f32 %v4618_v44, %v5500_v49 }
 0xad1   : > { %4238 = vmatprep.mubr.msk.f32.mxu1 %vm1459_vm1, %v5230_v60  ;;  %4396 = vmatpush3.bf16.xpose.msk.msra.mxu1 %vm5322_vm2, %v4391_v2  ;;  %v3260_v60 = vld [vmem:[#allocation10 + $0x8] sm:$0xff] }
 0xad2   : > { %v4405_v47 = vpack.c.bf16 %v3147_v22, %v3146_v25 }
 0xad4   : > { %4407 = vmatprep.subr.msk.bf16.mxu1 %vm5322_vm2, %v4405_v47  ;;  %4239 = vmatmul.mubr.msk.f32.gmra.mrb[72].mxu1 %vm1459_vm1, %v5228_v58  ;;  %v3252_v58 = vld [vmem:[#allocation8 + $0x8] sm:$0xff] }
 0xad5   : > { %4256 = vmatprep.mubr.msk.f32.mxu1 %vm1459_vm1, %v5234_v1  ;;  %3347 = vmatprep.mubr.f32.mxu0 %v3252_v58  ;;  %v4868_v1 = vmov 0  }
 0xad6   : > { %4554 = vset.pattern.permute.xlu1 %v4868_v1  ;;  %4553 = vset.pattern.permute.xlu0 %v4868_v1 }
 0xad7   : > { %3270 = vperm.xlu1 %4554, %v3260_v60  }
 0xad8   : > { %4257 = vmatmul.mubr.msk.f32.vlgmr.msra.gmra.mrb[74].mxu1 %vm1459_vm1, %v5232_v63  ;;  %v3259_v63 = vld [vmem:[#allocation10] sm:$0xff] }
 0xad9   : > { %4259 = vmatprep.mubr.msk.f32.mxu1 %vm1459_vm1, %v5238_v5  ;;  %4410 = vmatpush3.bf16.xpose.msk.msra.mxu1 %vm5322_vm2, %v4405_v47  ;;  %v3262_v5 = vld [vmem:[#allocation10 + $0x18] sm:$0xff] }
 0xada   : > { %3265 = vperm.xlu0 %4553, %v3259_v63  }
 0xadc   : > { %4260 = vmatmul.mubr.msk.f32.gmra.mrb[76].mxu1 %vm1459_vm1, %v5236_v4  ;;  %v3261_v4 = vld [vmem:[#allocation10 + $0x10] sm:$0xff] }
 0xadd   : > { %4277 = vmatprep.mubr.msk.f32.mxu1 %vm1459_vm1, %v5242_v7  ;;  %3275 = vperm.xlu1 %4554, %v3261_v4  }
 0xae0   : > { %4278 = vmatmul.mubr.msk.f32.vlgmr.msra.gmra.mrb[78].mxu1 %vm1459_vm1, %v5240_v6 }
 0xae1   : > { %4280 = vmatprep.mubr.msk.f32.mxu1 %vm1459_vm1, %v5246_v9  ;;  %3280 = vperm.xlu1 %4554, %v3262_v5  }
 0xae4   : > { %4281 = vmatmul.mubr.msk.f32.gmra.mrb[80].mxu1 %vm1459_vm1, %v5244_v8 }
 0xb56   : > { %v3271_v46 = vpop.permute.xlu1 %3270 }
 0xb59   : > { %v3266_v28 = vpop.permute.xlu0 %3265 }
 0xb5c   : > { %v3276_v21 = vpop.permute.xlu1 %3275 }
 0xb60   : > { %v3281_v22 = vpop.permute.xlu1 %3280 }
 0xb8c   : > { %v4195_v6 = vpop.f32.mrb[62].mxu1 }
 0xb8d   : > { %v2280_v7 = vpop.f32.mrb[63].mxu1 }
 0xb8e   : > { %v4437_v48 = vpack.c.bf16 %v4195_v6, %v2280_v7 }
 0xb90   : > { %v4198_v9 = vpop.f32.mrb[64].mxu1 }
 0xb91   : > { %v2290_v23 = vpop.f32.mrb[65].mxu1 }
 0xb92   : > { %v4441_v31 = vpack.c.bf16 %v4198_v9, %v2290_v23 }
 0xb9b   : > { %v4216_v8 = vpop.f32.mrb[66].mxu1 }
 0xb9c   : > { %v2518_v30 = vpop.f32.mrb[67].mxu1 }
 0xb9d   : > { %v4411_v27 = vpack.c.bf16 %v4216_v8, %v2518_v30 }
 0xb9f   : > { %v4219_v49 = vpop.f32.mrb[68].mxu1  ;;  %4412 = vmatprep.subr.bf16.mxu0 %v4411_v27 }
 0xba0   : > { %v2528_v43 = vpop.f32.mrb[69].mxu1  ;;  %4414 = vmatpush3.bf16.msra.mxu0 %v4413_v56 }
 0xba1   : > { %v4415_v29 = vpack.c.bf16 %v4219_v49, %v2528_v43 }
 0xba3   : > { %v4237_v11 = vpop.f32.mrb[70].mxu1  ;;  %4416 = vmatprep.subr.bf16.mxu0 %v4415_v29 }
 0xba4   : > { %v2756_v16 = vpop.f32.mrb[71].mxu1  ;;  %4418 = vmatpush3.bf16.msra.mxu0 %v4417_v61 }
 0xba5   : > { %v4419_v13 = vpack.c.bf16 %v4237_v11, %v2756_v16 }
 0xba7   : > { %v4240_v50 = vpop.f32.mrb[72].mxu1  ;;  %4420 = vmatprep.subr.bf16.mxu0 %v4419_v13 }
 0xba8   : > { %v2766_v17 = vpop.f32.mrb[73].mxu1  ;;  %4422 = vmatpush3.bf16.msra.mxu0 %v4421_v54 }
 0xba9   : > { %v4423_v51 = vpack.c.bf16 %v4240_v50, %v2766_v17 }
 0xbab   : > { %v4258_v3 = vpop.f32.mrb[74].mxu1  ;;  %4424 = vmatprep.subr.bf16.mxu0 %v4423_v51 }
 0xbac   : > { %v2994_v55 = vpop.f32.mrb[75].mxu1  ;;  %4426 = vmatpush3.bf16.msra.mxu0 %v4425_v0  ;;  %v3251_v0 = vld [vmem:[#allocation8] sm:$0xff] }
 0xbad   : > { %v4427_v35 = vpack.c.bf16 %v4258_v3, %v2994_v55 }
 0xbaf   : > { %v4261_v56 = vpop.f32.mrb[76].mxu1  ;;  %4428 = vmatprep.subr.bf16.mxu0 %v4427_v35 }
 0xbb0   : > { %v3004_v57 = vpop.f32.mrb[77].mxu1  ;;  %4430 = vmatpush3.bf16.msra.mxu0 %v4429_v36  ;;  %v3255_v36 = vld [vmem:[#allocation8 + $0x20] sm:$0xff] }
 0xbb1   : > { %v4431_v59 = vpack.c.bf16 %v4261_v56, %v3004_v57 }
 0xbb3   : > { %v4279_v61 = vpop.f32.mrb[78].mxu1  ;;  %4432 = vmatprep.subr.bf16.mxu0 %v4431_v59 }
 0xbb4   : > { %v3232_v53 = vpop.f32.mrb[79].mxu1  ;;  %4434 = vmatpush3.bf16.msra.mxu0 %v4433_v40 }
 0xbb5   : > { %v4435_v41 = vpack.c.bf16 %v4279_v61, %v3232_v53 }
 0xbb7   : > { %v4282_v54 = vpop.f32.mrb[80].mxu1  ;;  %4436 = vmatprep.subr.bf16.mxu0 %v4435_v41 }
 0xbb8   : > { %v3242_v32 = vpop.f32.mrb[81].mxu1  ;;  %4438 = vmatpush3.bf16.msra.mxu0 %v4437_v48 }
 0xbb9   : > { %v4439_v62 = vpack.c.bf16 %v4282_v54, %v3242_v32 }
 0xbbb   : > { %4440 = vmatprep.subr.bf16.mxu0 %v4439_v62 }
 0xbbc   : > { %4442 = vmatpush3.bf16.msra.mxu0 %v4441_v31 }
 0xbbf   : > { %3348 = vmatmul.mubr.f32.vlgmr.msra.gmra.mrb[62].mxu0 %v3251_v0 }
 0xbc0   : > { %3352 = vmatprep.mubr.f32.mxu0 %v3254_v15 }
 0xbc3   : > { %3353 = vmatmul.mubr.f32.gmra.mrb[64].mxu0 %v3253_v33 }
 0xbc4   : > { %3357 = vmatprep.mubr.f32.mxu0 %v3256_v34 }
 0xbc7   : > { %3358 = vmatmul.mubr.f32.gmra.mrb[66].mxu0 %v3255_v36 }
 0xbc8   : > { %3362 = vmatprep.mubr.f32.mxu0 %v3258_v37 }
 0xbcb   : > { %3363 = vmatmul.mubr.f32.gmra.mrb[68].mxu0 %v3257_v39 }
 0xc92   : > { %v3943_v40 = vpop.f32.mrb[62].mxu0 }
 0xc93   : > { %v3944_v19 = vpop.f32.mrb[63].mxu0 }
 0xc94   : > { %v3945_v45 = vadd.f32 %v3944_v19, %v3943_v40 }
 0xc96   : > { %v3350_v18 = vadd.f32 %v3945_v45, %v3266_v28  ;;  %v3946_v20 = vpop.f32.mrb[64].mxu0 }
 0xc97   : > { %v3947_v52 = vpop.f32.mrb[65].mxu0 }
 0xc98   : > { %3368 = vst.msk [vmem:[%s342_s24] sm:$0xff] %vm1459_vm1, %v3350_v18  ;;  %v3948_v12 = vadd.f32 %v3947_v52, %v3946_v20 }
 0xc9a   : > { %v3355_v10 = vadd.f32 %v3948_v12, %v3271_v46  ;;  %v3949_v14 = vpop.f32.mrb[66].mxu0 }
 0xc9b   : > { %v3950_v24 = vpop.f32.mrb[67].mxu0 }
 0xc9c   : > { %3369 = vst.msk [vmem:[%s342_s24 + $0x8] sm:$0xff] %vm1459_vm1, %v3355_v10  ;;  %v3951_v38 = vadd.f32 %v3950_v24, %v3949_v14 }
 0xc9e   : > { %v3360_v26 = vadd.f32 %v3951_v38, %v3276_v21  ;;  %v3952_v2 = vpop.f32.mrb[68].mxu0 }
 0xc9f   : > { %v3953_v42 = vpop.f32.mrb[69].mxu0 }
 0xca0   : > { %3370 = vst.msk [vmem:[%s342_s24 + $0x10] sm:$0xff] %vm1459_vm1, %v3360_v26  ;;  %v3954_v44 = vadd.f32 %v3953_v42, %v3952_v2 }
 0xca2   : > { %v3365_v25 = vadd.f32 %v3954_v44, %v3281_v22 }
 0xca4   : > { %3371 = vst.msk [vmem:[%s342_s24 + $0x18] sm:$0xff] %vm1459_vm1, %v3365_v25 }
 0xca5   : > { %4776 = shalt.err (!%p4773_p5)
}
 0xca6   : > { %s4777_s8 = scalar_lea.hbm %s5597_s16, 512  ;;  %s4781_s3 = scalar_lea.hbm %s5652_s5, 1024 }
 0xca7   : > { %p4778_p12 = scmp.ne.s32.totalorder %s5597_s16, %s4777_s8  ;;  %p4782_p9 = scmp.lt.u32.totalorder %s5597_s16, %s5652_s5 }
 0xca8   : > { %p4783_p0 = scmp.lt.u32.totalorder %s4781_s3, %s4777_s8  ;;  %p4785_p4 = scmp.lt.u32.totalorder %s4777_s8, %s5597_s16 }
 0xca9   : > { %p4779_p6 = pnand %p4778_p12, %p5058_p3 }
 0xcaa   : > { %p4784_p2 = por %p4783_p0, %p4782_p9 }
 0xcab   : > { %p4780_p7 = pneg %p4779_p6 }
 0xcac   : > { %p4786_p8 = por %p4785_p4, %p4784_p2 }
 0xcae   : > { %p4787_p1 = pnand %p4786_p8, %p4780_p7 }
 0xcb0   : > { %4790 = shalt.err (!%p4787_p1)
}
 0xcb1   : > { %s4870_s4 = smov 128   ;;  %s4871_s28 = smov 8  }
 0xcb2   : > { %4463 = dma.vmem_to_hbm [thread:$0]  (%p5058_p3), %s5591_s26, 512, %s5597_s16, %s3373_s12, %s4870_s4, %s4870_s4, %s4871_s28  }
 0xcb3 PF: > { %s3402_s25 = sand.u32 1, %s4837_s18   ;;  %p5689_p13 = scmp.ne.s32.totalorder %s5667_s27, 0 }
 0xcb4   : > { %p5690_p10 = scmp.ge.s32.totalorder %s4857_s23, 2  ;;  %s3403_s24 = scalar_lea.sflag [#allocation4], %s3402_s25 }
 0xcb6   : > { %p4483_p11 = pnand %p5690_p10, %p5689_p13 }
 0xcb8   : > { %4832 = dma.done.wait (!%p4483_p11), %s3403_s24, 512  }
 0xcb9   : > { %4834 = vsyncadd (!%p4483_p11), %s3403_s24, 4294966784  ;;  %s25_s23 = sadd.s32 1, %s4857_s23   ;;  %s5691_s21 = sld [smem:[#allocation17_spill]] }
 0xcba   : > { %p22_p5 = scmp.ge.s32.totalorder %s25_s23, 4   ;;  %s5692_s22 = sld [smem:[#allocation18_spill]] }
 0xcbb   : > { %s5693_s18 = smov %s4841_s19  ;;  %s5694_s19 = smov %s4845_s20 }
 0xcbc   : > { %s5695_s20 = smov %s5067_s15  ;;  %24 = sbr.rel (!%p22_p5) target bundleno = 13 (0xd), region = 110 }
 0xcc3   :  { %3408 = vsyncpa [#allocation3], 1 }
 0xcc4   :  { %3410 = vsyncpa [#allocation3 + $0x1], 1 }
 0xcc5   :  { %3411 = vsyncpa [#allocation6], 1 }
 0xcc6   :  { %3413 = vsyncpa [#allocation6 + $0x1], 1 }
 0xcc7   :  { %3414 = vsyncpa [#allocation9], 1 }
 0xcc8   :  { %3415 = vsyncpa [#allocation4], 1 }
 0xcc9   :  { %3417 = vsyncpa [#allocation4 + $0x1], 1 }

</bundles_post_ra>
